<compile_context>
chip_gen: v5e
topology: v5e:2x2
jax: 0.10.0
libtpu: 0.0.40
codegen_flags: <defaults>
</compile_context>

<pallas_src>
import math

import jax
import jax.numpy as jnp
from jax.experimental import pallas as pl
from jax.experimental.pallas import tpu as pltpu


def linear_sine_kernel(x_ref, w_ref, b_ref, o_ref):
    # x_ref: (TM, D_in) row tile (compute dtype, e.g. bf16)
    # w_ref: (D_in, D_out_p) resident scale-folded weight (compute dtype)
    # b_ref: (1, D_out_p) resident bias (f32)
    # o_ref: (TM, D_out_p) lane-dense output
    acc = jnp.dot(x_ref[...], w_ref[...],
                  preferred_element_type=jnp.float32)      # MXU matmul, f32 acc
    acc = acc + b_ref[...]
    o_ref[...] = jnp.sin(acc).astype(o_ref.dtype)           # f32 sine, then cast


def _round_up(v, m):
    return ((v + m - 1) // m) * m


def _sublane(dtype):
    # native sublane multiple: 8 for f32, 16 for bf16, 32 for int8/fp8
    return max(8, 8 * 4 // jnp.dtype(dtype).itemsize)


def _tile_bytes(rows, cols, dtype):
    it = jnp.dtype(dtype).itemsize
    return _round_up(max(int(rows), 1), _sublane(dtype)) * _round_up(int(cols), 128) * it


_VMEM_SOFT_CAP = 48 * 1024 * 1024  # leave headroom under v7x's 64 MiB per-TC VMEM


def linear_sine(x, weight_t_scaled, bias_2d, out_features=None, *, tm=1024,
                out_dtype=None):
    """y = sin(x @ weight_t_scaled + bias).

    x:               (N, D_in)
    weight_t_scaled: (D_in, D_out_p) -- scale already folded in, D_out zero-padded
                     to a multiple of 128 (see pack_linear_sine_params), any dtype
                     (bf16 recommended).
    bias_2d:         (1, D_out_p) f32, zero-padded to match.
    out_features:    logical D_out (columns beyond it are sliced off).
    """
    N, D_in = x.shape
    d_in_w, d_out_p = weight_t_scaled.shape
    assert d_in_w == D_in, "weight/input feature mismatch"
    if out_features is None:
        out_features = d_out_p

    compute_dtype = weight_t_scaled.dtype
    if out_dtype is None:
        out_dtype = compute_dtype
    if x.dtype != compute_dtype:
        # In a full SIREN MLP the previous layer already emits compute_dtype, so
        # this cast (an extra HBM pass) only happens at the network input.
        x = x.astype(compute_dtype)

    if N == 0:
        return jnp.zeros((0, out_features), out_dtype)

    # ---- balanced row tiles, >=2 grid steps when possible (megacore) ----------
    sub = max(_sublane(compute_dtype), _sublane(out_dtype))
    n_tiles = max(pl.cdiv(N, tm), 2)          # want >=2 tiles for 2-TC chips
    n_tiles = min(n_tiles, pl.cdiv(N, sub))   # but keep tiles >= one sublane group
    n_tiles = max(n_tiles, 1)
    tm_eff = _round_up(pl.cdiv(N, n_tiles), sub)
    if tm_eff >= N:
        tm_eff = N                            # block dim == array dim is always legal

    def vmem_estimate(rows):
        return (2 * _tile_bytes(rows, D_in, compute_dtype)      # x (double-buffered)
                + 2 * _tile_bytes(rows, d_out_p, out_dtype)     # out (double-buffered)
                + 2 * _tile_bytes(D_in, d_out_p, compute_dtype) # weight (2x: default pipelining)
                + 2 * _tile_bytes(1, d_out_p, jnp.float32))     # bias

    while tm_eff > sub and vmem_estimate(tm_eff) > _VMEM_SOFT_CAP:
        tm_eff = max(sub, _round_up(tm_eff // 2, sub))

    grid = (pl.cdiv(N, tm_eff),)              # ragged last tile masked by Pallas
    vmem_need = vmem_estimate(tm_eff)
    vmem_limit = int(vmem_need * 1.25) + (2 << 20)   # ~1.25x need + fixed headroom

    in_itemsize = jnp.dtype(compute_dtype).itemsize
    out_itemsize = jnp.dtype(out_dtype).itemsize
    cost = pl.CostEstimate(
        flops=2 * N * D_in * d_out_p,
        transcendentals=N * d_out_p,
        bytes_accessed=(N * D_in * in_itemsize + D_in * d_out_p * in_itemsize
                        + d_out_p * 4 + N * d_out_p * out_itemsize),
    )

    out = pl.pallas_call(
        linear_sine_kernel,
        out_shape=jax.ShapeDtypeStruct((N, d_out_p), out_dtype),
        grid_spec=pltpu.PrefetchScalarGridSpec(
            num_scalar_prefetch=0,
            grid=grid,
            in_specs=[
                pl.BlockSpec((tm_eff, D_in), lambda i: (i, 0)),    # x row tile
                pl.BlockSpec((D_in, d_out_p), lambda i: (0, 0)),   # weight (resident)
                pl.BlockSpec((1, d_out_p), lambda i: (0, 0)),      # bias (resident)
            ],
            out_specs=pl.BlockSpec((tm_eff, d_out_p), lambda i: (i, 0)),
        ),
        compiler_params=pltpu.CompilerParams(
            dimension_semantics=("parallel",),
            vmem_limit_bytes=vmem_limit),
        cost_estimate=cost,
    )(x, weight_t_scaled, bias_2d)

    if d_out_p != out_features:
        out = out[:, :out_features]   # only when D_out is not already a multiple of 128
    return out


def init_linear_sine(key, in_features, out_features, scale_value=1.0,
                     first_layer=False):
    """Mirror LinearSine.__init__/reset_parameters. Returns f32 (scale, weight, bias)
    with PyTorch layout: weight (out_features, in_features), bias (out_features,)."""
    k_w, k_b = jax.random.split(key)
    scale = jnp.ones((in_features,), jnp.float32) * jnp.asarray(scale_value, jnp.float32)

    w = jax.random.uniform(k_w, (out_features, in_features),
                           jnp.float32, minval=-1.0, maxval=1.0)
    if first_layer:
        weight_width = jnp.full((in_features,), 1.0 / in_features, jnp.float32)
    else:
        weight_width = jnp.float32(math.sqrt(6.0 / in_features)) / scale
    w = w * weight_width[None, :]

    bound = 1.0 / math.sqrt(in_features)   # nn.Linear default bias init
    b = jax.random.uniform(k_b, (out_features,),
                           jnp.float32, minval=-bound, maxval=bound)
    return scale, w, b


def pack_linear_sine_params(scale, weight, bias, *, param_dtype=jnp.bfloat16):
    """One-time packing for the kernel: fold the per-input-feature scale into the
    transposed weight (sin((x*s) @ W.T + b) == sin(x @ (s[:,None]*W.T) + b)),
    zero-pad D_out to a multiple of 128 (lane-dense stores), and cast the weight
    to the compute dtype. Bias stays f32 (added to the f32 accumulator)."""
    out_features, in_features = weight.shape
    w_t = (scale[:, None] * weight.T)                     # (in, out), f32
    d_out_p = _round_up(out_features, 128)
    if d_out_p != out_features:
        w_t = jnp.pad(w_t, ((0, 0), (0, d_out_p - out_features)))
        bias = jnp.pad(bias, (0, d_out_p - out_features))
    return w_t.astype(param_dtype), bias.reshape(1, d_out_p).astype(jnp.float32)


if __name__ == "__main__":
    key = jax.random.PRNGKey(0)
    k_x, k_p = jax.random.split(key)

    # Small shapes: N=200 exercises the ragged last row tile, D_out=64 exercises
    # the one-time lane padding (64 -> 128).
    N, D_in, D_out = 200, 32, 64
    x = jax.random.normal(k_x, (N, D_in), jnp.float32)

    scale, weight, bias = init_linear_sine(k_p, D_in, D_out,
                                           scale_value=30.0, first_layer=False)

    # Module-semantics reference (plain JAX, f32): sin(Linear(scale * x)).
    ref = jnp.sin((x * scale[None, :]) @ weight.T + bias[None, :])

    # 1) f32 kernel path: tight check of the forward semantics (incl. scale folding).
    w_f32, b_f32 = pack_linear_sine_params(scale, weight, bias,
                                           param_dtype=jnp.float32)
    out_f32 = jax.block_until_ready(
        linear_sine(x, w_f32, b_f32, D_out, out_dtype=jnp.float32))
    assert out_f32.shape == (N, D_out)
    assert jnp.allclose(out_f32, ref, atol=1e-4, rtol=1e-4), "f32 path mismatch"

    # 2) bf16 kernel path (production default): compare against a reference that
    #    uses the same bf16-quantized inputs/weights but f32 math, so the check
    #    isolates the kernel (accumulation order + output rounding) only.
    w_bf16, b_bf16 = pack_linear_sine_params(scale, weight, bias,
                                             param_dtype=jnp.bfloat16)
    out_bf16 = jax.block_until_ready(linear_sine(x, w_bf16, b_bf16, D_out))
    ref_bf16 = jnp.sin(x.astype(jnp.bfloat16).astype(jnp.float32)
                       @ w_bf16.astype(jnp.float32) + b_bf16[0])[:, :D_out]
    assert out_bf16.shape == (N, D_out)
    max_err = jnp.max(jnp.abs(out_bf16.astype(jnp.float32) - ref_bf16))
    assert max_err < 2e-2, f"bf16 path mismatch, max_err={max_err}"

    print("KERNEL_OK")
</pallas_src>

<mosaic_0001>
module attributes {stable_mosaic.version = 11 : i64} {
  func.func @linear_sine_kernel(%arg0: i32, %arg1: memref<104x32xf32, #tpu.memory_space<vmem>>, %arg2: memref<32x128xf32, #tpu.memory_space<vmem>>, %arg3: memref<1x128xf32, #tpu.memory_space<vmem>>, %arg4: memref<104x128xf32, #tpu.memory_space<vmem>>) attributes {dimension_semantics = [#tpu.dimension_semantics<parallel>], iteration_bounds = array<i64: 2>, scalar_prefetch = 0 : i64, scratch_operands = 0 : i64, tpu.core_type = #tpu.core_type<tc>, window_params = [{transform_indices = @transform_0, window_bounds = array<i64: 104, 32>}, {pipeline_mode = #tpu.pipeline_mode<synchronous>, transform_indices = @transform_1, window_bounds = array<i64: 32, 128>}, {pipeline_mode = #tpu.pipeline_mode<synchronous>, transform_indices = @transform_2, window_bounds = array<i64: 1, 128>}, {transform_indices = @transform_3, window_bounds = array<i64: 104, 128>}]} {
    %c0 = arith.constant 0 : index
    %c0_0 = arith.constant 0 : index
    %0 = vector.load %arg1[%c0, %c0_0] : memref<104x32xf32, #tpu.memory_space<vmem>>, vector<104x32xf32>
    %c0_1 = arith.constant 0 : index
    %c0_2 = arith.constant 0 : index
    %1 = vector.load %arg2[%c0_1, %c0_2] : memref<32x128xf32, #tpu.memory_space<vmem>>, vector<32x128xf32>
    %cst = arith.constant dense<0.000000e+00> : vector<104x128xf32>
    %2 = tpu.matmul %0, %1, %cst {dimension_numbers = #tpu.dot_dimension_numbers<[1], [0], [0], [1], [0, 0, 1, 1], [], []>} : vector<104x32xf32>, vector<32x128xf32>, vector<104x128xf32> -> vector<104x128xf32>
    %c0_3 = arith.constant 0 : index
    %c0_4 = arith.constant 0 : index
    %3 = vector.load %arg3[%c0_3, %c0_4] : memref<1x128xf32, #tpu.memory_space<vmem>>, vector<1x128xf32>
    %4 = vector.broadcast %3 : vector<1x128xf32> to vector<104x128xf32>
    %5 = arith.addf %2, %4 : vector<104x128xf32>
    %6 = math.sin %5 : vector<104x128xf32>
    %c0_5 = arith.constant 0 : index
    %c0_6 = arith.constant 0 : index
    %7 = vector.load %arg4[%c0_5, %c0_6] : memref<104x128xf32, #tpu.memory_space<vmem>>, vector<104x128xf32>
    tpu.vector_store %arg4[%c0_5, %c0_6], %6 {strides = array<i32>} : memref<104x128xf32, #tpu.memory_space<vmem>>, vector<104x128xf32>,
    return
  }
  func.func @transform_0(%arg0: i32) -> (i32, i32) {
    %c0_i32 = arith.constant 0 : i32
    %c0_i32_0 = arith.constant 0 : i32
    return %arg0, %c0_i32 : i32, i32
  }
  func.func @transform_1(%arg0: i32) -> (i32, i32) {
    %c0_i32 = arith.constant 0 : i32
    %c0_i32_0 = arith.constant 0 : i32
    %c0_i32_1 = arith.constant 0 : i32
    return %c0_i32, %c0_i32_0 : i32, i32
  }
  func.func @transform_2(%arg0: i32) -> (i32, i32) {
    %c0_i32 = arith.constant 0 : i32
    %c0_i32_0 = arith.constant 0 : i32
    %c0_i32_1 = arith.constant 0 : i32
    return %c0_i32, %c0_i32_0 : i32, i32
  }
  func.func @transform_3(%arg0: i32) -> (i32, i32) {
    %c0_i32 = arith.constant 0 : i32
    %c0_i32_0 = arith.constant 0 : i32
    return %arg0, %c0_i32 : i32, i32
  }
}

</mosaic_0001>

<bundles_post_ra>
// kernel: tpu_custom_call.1
= control target key start
LH: loop header
LB: loop body
LE: loop exit
PB: predicated region body
PF: predicated region fallthrough
CT: control target
= control target key end

     0   :  { %8 = vsyncpa [#allocation3], 0  ;;  %s4236_s0 = inlined_call_operand.vmem [shape: f32[200,32], index: 0, kind: input, shape index: {}]   ;;  %s4237_s1 = inlined_call_operand.vmem [shape: f32[32,128], index: 1, kind: input, shape index: {}]   ;;  %s4238_s2 = inlined_call_operand.vmem [shape: f32[1,128], index: 2, kind: input, shape index: {}]   ;;  %s4239_s3 = inlined_call_operand.hbm [shape: f32[200,128], index: 3, kind: output, shape index: {}]  }
   0x1   :  { %10 = vsyncpa [#allocation3 + $0x1], 0  ;;  %s2659_s12 = smov 0   ;;  %s2661_s13 = smov 0  }
   0x2   :  { %s2663_s14 = smov 0   ;;  %s2665_s15 = smov 0  }
   0x3 LB: > { %s2680_s16 = sadd.s32 4294967295, %s2627_s15   ;;  %s2426_s17 = sadd.s32 4294967294, %s2627_s15   ;;  %s2627_s15 = sphi %s2665_s15, %s4264_s15   ;;  %s2623_s14 = sphi %s2663_s14, %s4263_s14   ;;  %s2619_s13 = sphi %s2661_s13, %s4262_s13   ;;  %s2615_s12 = sphi %s2659_s12, %s4261_s12  }
   0x4   : > { %s2684_s18 = sadd.s32 1, %s2627_s15   ;;  %s91_s19 = sadd.s32 1, %s2623_s14 }
   0x5   : > { %s88_s20 = ssub.s32 %s2627_s15, %s2684_s18  ;;  %p101_p0 = scmp.ne.s32.totalorder %s2623_s14, %s2619_s13 }
   0x6   : > { %p89_p1 = scmp.eq.s32.totalorder %s88_s20, 0  ;;  %p102_p2 = scmp.eq.s32.totalorder %s2680_s16, 1 }
   0x7   : > { %p107_p3 = scmp.ne.s32.totalorder %s2619_s13, %s2615_s12  ;;  %p108_p4 = scmp.eq.s32.totalorder %s2426_s17, 1 }
   0x8   : > { %s2695_s21 = scalar_select %p89_p1, %s2623_s14, %s91_s19  }
   0x9   : > { %p2697_p5 = por %p102_p2, %p101_p0  ;;  %p2701_p6 = por %p108_p4, %p107_p3 }
   0xa   : > { %p2429_p7 = scmp.ge.s32.totalorder %s2627_s15, 1  ;;  %p149_p8 = scmp.lt.s32.totalorder %s2627_s15, 3 }
   0xc   : > { %p150_p9 = pnand %p2429_p7, %p149_p8 }
   0xd   : > { %s2714_s28 = smul.u32 (!%p150_p9), 13, %s2680_s16  ;;  %s174_s11 = sand.u32 (!%p150_p9), 1, %s2619_s13  }
   0xe   : > { %153 = sbr.rel (%p150_p9) target bundleno = 715 (0x2cb), region = 32  ;;  %s4175_s30 = scalar_lea.sflag (!%p150_p9), [#allocation3], %s174_s11 }
   0xf   : > { %p182_p10 = scmp.lt.s32.totalorder (!%p150_p9), %s2714_s28, 24  ;;  %s2503_s20 = smul.u32 (!%p150_p9), 104, %s174_s11 }
  0x11   : > { %s3055_s24 = scalar_lea.vmem (!%p150_p9), [#allocation2], %s2503_s20 }
  0x13   : > { %v212_v0 = vld [vmem:[%s4237_s1 + $0x18] sm:$0xff]  ;;  %v211_v1 = vld [vmem:[%s4237_s1 + $0x10] sm:$0xff]  ;;  %v210_v2 = vld [vmem:[%s4237_s1 + $0x8] sm:$0xff]  ;;  %s183_s6 = scalar_select %p182_p10, %s2714_s28, 24  ;;  %vm217_vm0 = vcmask 261120  }
  0x14   : > { %269 = vmatpush.msra.mxu0 %v212_v0  ;;  %2491 = vmatpush.msra.mxu1 %v212_v0  ;;  %v209_v3 = vld [vmem:[%s4237_s1] sm:$0xff]  ;;  %v2629_v46 = vmov 683565275   ;;  %v2630_v48 = vmov 2475754826   ;;  %s2350_s4 = ssub.s32 (%p2697_p5), 25, %s2714_s28 }
  0x15   : > { %2492 = vmatpush.msra.mxu2 %v212_v0  ;;  %2493 = vmatpush.msra.mxu3 %v212_v0  ;;  %s2430_s7 = sshll.u32 %s183_s6, 3  ;;  %v2744_v17 = vld [vmem:[%s4238_s2] ss:$0 sm:$0xff]  ;;  %v2631_v50 = vmov 2131351028   ;;  %p2351_p11 = scmp.lt.s32.totalorder (%p2697_p5), %s2350_s4, 13 }
  0x16   : > { %270 = vmatpush.msra.mxu0 %v211_v1  ;;  %2494 = vmatpush.msra.mxu1 %v211_v1  ;;  %s185_s10 = scalar_lea.vmem %s4236_s0, %s2430_s7  ;;  %v2632_v52 = vmov 2102212464   ;;  %v2633_v54 = vmov 920167782   ;;  %v2634_v63 = vmov 1326507024  }
  0x17   : > { %2495 = vmatpush.msra.mxu2 %v211_v1  ;;  %2496 = vmatpush.msra.mxu3 %v211_v1  ;;  %v196_v4 = vld [vmem:[%s185_s10] sm:$0xff]  ;;  %v199_v5 = vld [vmem:[%s185_s10 + $0x18] sm:$0xff]  ;;  %v202_v6 = vld [vmem:[%s185_s10 + $0x30] sm:$0xff] }
  0x18   : > { %271 = vmatpush.msra.mxu0 %v210_v2  ;;  %2497 = vmatpush.msra.mxu1 %v210_v2  ;;  %v206_v7 = vld [vmem:[%s185_s10 + $0x50] sm:$0xff]  ;;  %v197_v8 = vld [vmem:[%s185_s10 + $0x8] sm:$0xff]  ;;  %v200_v9 = vld [vmem:[%s185_s10 + $0x20] sm:$0xff] }
  0x19   : > { %2498 = vmatpush.msra.mxu2 %v210_v2  ;;  %2499 = vmatpush.msra.mxu3 %v210_v2  ;;  %v203_v10 = vld [vmem:[%s185_s10 + $0x38] sm:$0xff]  ;;  %v198_v12 = vld [vmem:[%s185_s10 + $0x10] sm:$0xff]  ;;  %v201_v13 = vld [vmem:[%s185_s10 + $0x28] sm:$0xff] }
  0x1a   : > { %272 = vmatpush.msra.mxu0 %v209_v3  ;;  %2500 = vmatpush.msra.mxu1 %v209_v3  ;;  %v207_v11 = vld [vmem:[%s185_s10 + $0x58] sm:$0xff]  ;;  %v204_v14 = vld [vmem:[%s185_s10 + $0x40] sm:$0xff]  ;;  %v205_v16 = vld [vmem:[%s185_s10 + $0x48] sm:$0xff] }
  0x1b   : > { %2501 = vmatpush.msra.mxu2 %v209_v3  ;;  %2502 = vmatpush.msra.mxu3 %v209_v3  ;;  %v208_v15 = vld [vmem:[%s185_s10 + $0x60] sm:$0xff] }
  0x1c   : > { %2431 = vmatmul.msk.f32.vlgmr.msra.gmra.mxu0 %vm217_vm0, %v196_v4  ;;  %2434 = vmatmul.msk.f32.vlgmr.msra.gmra.mxu1 %vm217_vm0, %v199_v5 }
  0x1d   : > { %2437 = vmatmul.msk.f32.vlgmr.msra.gmra.mxu2 %vm217_vm0, %v202_v6  ;;  %2441 = vmatmul.msk.f32.vlgmr.msra.gmra.mxu3 %vm217_vm0, %v206_v7 }
  0x24   : > { %2432 = vmatmul.msk.f32.gmra.mxu0 %vm217_vm0, %v197_v8  ;;  %2435 = vmatmul.msk.f32.gmra.mxu1 %vm217_vm0, %v200_v9 }
  0x25   : > { %2438 = vmatmul.msk.f32.gmra.mxu2 %vm217_vm0, %v203_v10  ;;  %2442 = vmatmul.msk.f32.gmra.mxu3 %vm217_vm0, %v207_v11 }
  0x2c   : > { %2433 = vmatmul.msk.f32.gmra.mxu0 %vm217_vm0, %v198_v12  ;;  %2436 = vmatmul.msk.f32.gmra.mxu1 %vm217_vm0, %v201_v13 }
  0x2d   : > { %2439 = vmatmul.msk.f32.gmra.mxu2 %vm217_vm0, %v204_v14  ;;  %2443 = vmatmul.msk.f32.gmra.mxu3 %vm217_vm0, %v208_v15 }
  0x35   : > { %2440 = vmatmul.msk.f32.gmra.mxu2 %vm217_vm0, %v205_v16 }
  0x99   : > { %v274_v18 = vpop.f32.mrf.mxu0  ;;  %v283_v19 = vpop.f32.mrf.mxu1 }
  0x9a   : > { %v2747_v20 = vadd.f32 %v2744_v17, %v274_v18  ;;  %v2750_v21 = vadd.f32 %v2744_v17, %v283_v19 }
  0x9c   : > { %v313_v22 = vand.u32 2147483647, %v2747_v20  ;;  %v316_v23 = vand.u32 2139095040, %v2747_v20  ;;  %v778_v24 = vand.u32 2147483647, %v2750_v21  ;;  %v781_v25 = vand.u32 2139095040, %v2750_v21 }
  0x9e   : > { %v317_v26 = vshrl.u32 %v316_v23, 23  ;;  %v320_v27 = vand.u32 8388607, %v313_v22  ;;  %v782_v28 = vshrl.u32 %v781_v25, 23  ;;  %v785_v29 = vand.u32 8388607, %v778_v24 }
  0xa0   : > { %v2444_v30 = vadd.s32 4294967169, %v317_v26  ;;  %v321_v31 = vor.u32 8388608, %v320_v27  ;;  %v2453_v32 = vadd.s32 4294967169, %v782_v28  ;;  %v786_v34 = vor.u32 8388608, %v785_v29  ;;  %v292_v36 = vpop.f32.mrf.mxu2 }
  0xa1   : > { %v2763_v41 = vadd.f32 %v2744_v17, %v292_v36 }
  0xa2   : > { %v323_v33 = vadd.s32 1, %v2444_v30  ;;  %v788_v35 = vadd.s32 1, %v2453_v32  ;;  %v2760_v38 = vshll.u32 %v321_v31, 8  ;;  %v2769_v44 = vshll.u32 %v786_v34, 8 }
  0xa3   : > { %v1246_v61 = vand.u32 2139095040, %v2763_v41 }
  0xa4   : > { %vm324_vm1 = vcmp.gt.s32.totalorder %v323_v33, 0  ;;  %vm789_vm2 = vcmp.gt.s32.totalorder %v788_v35, 0  ;;  %v362_v56 = vand.u32 65535, %v2760_v38  ;;  %v363_v57 = vshrl.u32 %v2760_v38, 16 }
  0xa5   : > { %v325_v37 = vsel %vm324_vm1, %v323_v33, 0  ;;  %v790_v40 = vsel %vm789_vm2, %v788_v35, 0  ;;  %v2791_v7 = vand.u32 65535, %v2769_v44  ;;  %v2822_v27 = vshrl.u32 %v2769_v44, 16 }
  0xa6   : > { %v327_v39 = vand.u32 31, %v325_v37  ;;  %v2765_v42 = vshrl.u32 %v325_v37, 5  ;;  %v2767_v43 = vand.u32 31, %v790_v40  ;;  %v2828_v34 = vshrl.u32 %v790_v40, 5 }
  0xa8   : > { %v328_v45 = vsub.s32 32, %v327_v39  ;;  %v330_v47 = vshll.u32 %v2629_v46, %v327_v39  ;;  %v333_v49 = vshll.u32 %v2630_v48, %v327_v39  ;;  %v336_v51 = vshll.u32 %v2631_v50, %v327_v39 }
  0xa9   : > { %v339_v53 = vshll.u32 %v2632_v52, %v327_v39  ;;  %v342_v55 = vshll.u32 %v2633_v54, %v327_v39  ;;  %vm345_vm3 = vcmp.lt.s32.totalorder %v2765_v42, 1  ;;  %vm348_vm4 = vcmp.lt.s32.totalorder %v2765_v42, 4 }
  0xaa   : > { %v331_v58 = vshrl.u32 %v2630_v48, %v328_v45  ;;  %v334_v59 = vshrl.u32 %v2631_v50, %v328_v45  ;;  %v337_v60 = vshrl.u32 %v2632_v52, %v328_v45  ;;  %v340_v62 = vshrl.u32 %v2633_v54, %v328_v45 }
  0xab   : > { %v343_v0 = vshrl.u32 %v2634_v63, %v328_v45  ;;  %v2787_v4 = vsub.s32 32, %v2767_v43  ;;  %vm347_vm5 = vcmp.lt.s32.totalorder %v2765_v42, 3  ;;  %v329_v8 = vshrl.u32 %v2629_v46, %v328_v45 }
  0xac   : > { %v332_v1 = vor.u32 %v331_v58, %v330_v47  ;;  %v335_v2 = vor.u32 %v334_v59, %v333_v49  ;;  %v338_v3 = vor.u32 %v337_v60, %v336_v51  ;;  %v341_v5 = vor.u32 %v340_v62, %v339_v53 }
  0xad   : > { %v344_v6 = vor.u32 %v343_v0, %v342_v55  ;;  %vm346_vm6 = vcmp.lt.s32.totalorder %v2765_v42, 2  ;;  %v795_v13 = vshll.u32 %v2629_v46, %v2767_v43  ;;  %v798_v14 = vshll.u32 %v2630_v48, %v2767_v43 }
  0xae   : > { %v353_v9 = vsel %vm345_vm3, %v332_v1, %v335_v2  ;;  %v357_v10 = vsel %vm345_vm3, %v335_v2, %v338_v3  ;;  %v354_v11 = vsel %vm348_vm4, %v341_v5, 920167782  ;;  %v350_v15 = vsel %vm348_vm4, %v338_v3, 2102212464 }
  0xaf   : > { %v358_v12 = vsel %vm348_vm4, %v344_v6, 1326507024  ;;  %v355_v16 = vsel %vm347_vm5, %v338_v3, %v354_v11  ;;  %v796_v19 = vshrl.u32 %v2630_v48, %v2787_v4  ;;  %v799_v26 = vshrl.u32 %v2631_v50, %v2787_v4 }
  0xb0   : > { %v359_v18 = vsel %vm347_vm5, %v341_v5, %v358_v12  ;;  %v356_v23 = vsel %vm346_vm6, %v353_v9, %v355_v16  ;;  %v349_v32 = vsel %vm345_vm3, %v329_v8, %v332_v1  ;;  %v351_v33 = vsel %vm347_vm5, %v335_v2, %v350_v15 }
  0xb1   : > { %v360_v25 = vsel %vm346_vm6, %v357_v10, %v359_v18  ;;  %v386_v30 = vand.u32 65535, %v356_v23  ;;  %v387_v31 = vshrl.u32 %v356_v23, 16  ;;  %v2830_v35 = vor.u32 %v796_v19, %v795_v13 }
  0xb2   : > { %v364_v28 = vand.u32 65535, %v360_v25  ;;  %v365_v29 = vshrl.u32 %v360_v25, 16  ;;  %v2832_v45 = vor.u32 %v799_v26, %v798_v14  ;;  %v801_v53 = vshll.u32 %v2631_v50, %v2767_v43 }
  0xb3   : > { %v388_v47 = vmul.u32 %v386_v30, %v362_v56  ;;  %v389_v49 = vmul.u32 %v387_v31, %v362_v56  ;;  %v390_v51 = vmul.u32 %v386_v30, %v363_v57  ;;  %v802_v40 = vshrl.u32 %v2632_v52, %v2787_v4 }
  0xb4   : > { %v366_v36 = vmul.u32 %v364_v28, %v362_v56  ;;  %v367_v37 = vmul.u32 %v365_v29, %v362_v56  ;;  %v368_v39 = vmul.u32 %v364_v28, %v363_v57  ;;  %v369_v55 = vmul.u32 %v365_v29, %v363_v57 }
  0xb5   : > { %v391_v62 = vmul.u32 %v387_v31, %v363_v57  ;;  %v392_v0 = vshll.u32 %v389_v49, 16  ;;  %v394_v1 = vshll.u32 %v390_v51, 16  ;;  %v804_v56 = vshll.u32 %v2632_v52, %v2767_v43 }
  0xb6   : > { %v370_v58 = vshll.u32 %v367_v37, 16  ;;  %v372_v59 = vshll.u32 %v368_v39, 16  ;;  %v371_v60 = vshrl.u32 %v367_v37, 16  ;;  %v373_v2 = vshrl.u32 %v368_v39, 16 }
  0xb7   : > { %v2635_v5 = vmov 0   ;;  %vm396_vm8 = vc.u32 %v388_v47, %v392_v0  ;;  %v398_v8 = vadd.s32 %v392_v0, %v388_v47  ;;  %v805_v9 = vshrl.u32 %v2633_v54, %v2787_v4 }
  0xb8   : > { %vm374_vm7 = vc.u32 %v366_v36, %v370_v58  ;;  %v376_v3 = vadd.s32 %v370_v58, %v366_v36  ;;  %v397_v57 = vsel %vm396_vm8, 1, %v2635_v5  ;;  %v807_v11 = vshll.u32 %v2633_v54, %v2767_v43 }
  0xb9   : > { %v375_v6 = vsel %vm374_vm7, 1, %v2635_v5  ;;  %v399_v13 = vadd.s32 %v397_v57, %v391_v62  ;;  %vm400_vm10 = vc.u32 %v398_v8, %v394_v1  ;;  %v803_v14 = vor.u32 %v802_v40, %v801_v53 }
  0xba   : > { %v377_v10 = vadd.s32 %v375_v6, %v369_v55  ;;  %vm378_vm9 = vc.u32 %v376_v3, %v372_v59  ;;  %v401_v16 = vsel %vm400_vm10, 1, %v2635_v5  ;;  %v806_v18 = vor.u32 %v805_v9, %v804_v56 }
  0xbb   : > { %v379_v12 = vsel %vm378_vm9, 1, %v2635_v5  ;;  %v808_v19 = vshrl.u32 %v2634_v63, %v2787_v4  ;;  %v393_v23 = vshrl.u32 %v389_v49, 16  ;;  %v403_v25 = vadd.s32 %v401_v16, %v399_v13 }
  0xbc   : > { %v381_v15 = vadd.s32 %v379_v12, %v377_v10  ;;  %vm810_vm11 = vcmp.lt.s32.totalorder %v2828_v34, 1  ;;  %vm812_vm12 = vcmp.lt.s32.totalorder %v2828_v34, 3  ;;  %vm811_vm13 = vcmp.lt.s32.totalorder %v2828_v34, 2 }
  0xbd   : > { %v809_v43 = vor.u32 %v808_v19, %v807_v11  ;;  %vm813_vm14 = vcmp.lt.s32.totalorder %v2828_v34, 4  ;;  %v395_v28 = vshrl.u32 %v390_v51, 16  ;;  %v404_v29 = vadd.s32 %v403_v25, %v393_v23 }
  0xbe   : > { %v382_v26 = vadd.s32 %v381_v15, %v371_v60  ;;  %v818_v30 = vsel %vm810_vm11, %v2830_v35, %v2832_v45  ;;  %v819_v31 = vsel %vm813_vm14, %v806_v18, 920167782  ;;  %v2862_v37 = vadd.s32 %v398_v8, %v394_v1 }
  0xbf   : > { %v820_v39 = vsel %vm812_vm12, %v803_v14, %v819_v31  ;;  %v822_v47 = vsel %vm810_vm11, %v2832_v45, %v803_v14  ;;  %v352_v49 = vsel %vm346_vm6, %v349_v32, %v351_v33  ;;  %v405_v51 = vadd.s32 %v404_v29, %v395_v28 }
  0xc0   : > { %v2860_v36 = vadd.s32 %v382_v26, %v373_v2  ;;  %v821_v53 = vsel %vm811_vm13, %v818_v30, %v820_v39  ;;  %v823_v55 = vsel %vm813_vm14, %v809_v43, 1326507024  ;;  %v1243_v32 = vand.u32 2147483647, %v2763_v41 }
  0xc1   : > { %v824_v58 = vsel %vm812_vm12, %v806_v18, %v823_v55  ;;  %v851_v59 = vand.u32 65535, %v821_v53  ;;  %v409_v40 = vadd.s32 1, %v405_v51  ;;  %v852_v42 = vshrl.u32 %v821_v53, 16 }
  0xc2   : > { %vm408_vm15 = vc.u32 %v2860_v36, %v2862_v37  ;;  %v825_v60 = vsel %vm811_vm13, %v822_v47, %v824_v58  ;;  %v406_v33 = vmul.u32 %v2760_v38, %v352_v49  ;;  %v1247_v6 = vshrl.u32 %v1246_v61, 23 }
  0xc3   : > { %v829_v62 = vand.u32 65535, %v825_v60  ;;  %v830_v0 = vshrl.u32 %v825_v60, 16  ;;  %v855_v1 = vmul.u32 %v851_v59, %v2822_v27  ;;  %v410_v2 = vsel %vm408_vm15, %v409_v40, %v405_v51 }
  0xc4   : > { %v853_v3 = vmul.u32 %v851_v59, %v2791_v7  ;;  %v854_v56 = vmul.u32 %v852_v42, %v2791_v7  ;;  %v411_v8 = vadd.s32 %v410_v2, %v406_v33  ;;  %v794_v38 = vshrl.u32 %v2629_v46, %v2787_v4 }
  0xc5   : > { %v831_v9 = vmul.u32 %v829_v62, %v2791_v7  ;;  %v832_v10 = vmul.u32 %v830_v0, %v2791_v7  ;;  %v833_v57 = vmul.u32 %v829_v62, %v2822_v27  ;;  %v815_v11 = vsel %vm813_vm14, %v803_v14, 2102212464 }
  0xc6   : > { %v857_v12 = vshll.u32 %v854_v56, 16  ;;  %v859_v13 = vshll.u32 %v855_v1, 16  ;;  %v412_v15 = vadd.s32 536870912, %v411_v8  ;;  %v856_v61 = vmul.u32 %v852_v42, %v2822_v27 }
  0xc7   : > { %v835_v16 = vshll.u32 %v832_v10, 16  ;;  %v837_v18 = vshll.u32 %v833_v57, 16  ;;  %v834_v19 = vmul.u32 %v830_v0, %v2822_v27  ;;  %v2462_v7 = vadd.s32 4294967169, %v1247_v6 }
  0xc8   : > { %vm861_vm0 = vc.u32 %v853_v3, %v857_v12  ;;  %v863_v23 = vadd.s32 %v857_v12, %v853_v3  ;;  %v413_v25 = vshrl.u32 %v412_v15, 30  ;;  %v1250_v28 = vand.u32 8388607, %v1243_v32 }
  0xc9   : > { %vm839_vm1 = vc.u32 %v831_v9, %v835_v16  ;;  %v841_v26 = vadd.s32 %v835_v16, %v831_v9  ;;  %v862_v4 = vsel %vm861_vm0, 1, %v2635_v5  ;;  %v814_v27 = vsel %vm810_vm11, %v794_v38, %v2830_v35 }
  0xca   : > { %v840_v43 = vsel %vm839_vm1, 1, %v2635_v5  ;;  %v864_v14 = vadd.s32 %v862_v4, %v856_v61  ;;  %vm865_vm2 = vc.u32 %v863_v23, %v859_v13  ;;  %v414_v29 = vshll.u32 %v413_v25, 30 }
  0xcb   : > { %v842_v30 = vadd.s32 %v840_v43, %v834_v19  ;;  %vm843_vm3 = vc.u32 %v841_v26, %v837_v18  ;;  %v816_v31 = vsel %vm812_vm12, %v2832_v45, %v815_v11  ;;  %v866_v47 = vsel %vm865_vm2, 1, %v2635_v5 }
  0xcc   : > { %v844_v39 = vsel %vm843_vm3, 1, %v2635_v5  ;;  %v1253_v49 = vadd.s32 1, %v2462_v7  ;;  %v415_v51 = vsub.s32 %v411_v8, %v414_v29  ;;  %v836_v53 = vshrl.u32 %v832_v10, 16 }
  0xcd   : > { %v846_v55 = vadd.s32 %v844_v39, %v842_v30  ;;  %v868_v58 = vadd.s32 %v866_v47, %v864_v14  ;;  %vm315_vm4 = vcmp.lt.s32.totalorder %v2747_v20, 0  ;;  %v437_v59 = vsub.s32 4, %v413_v25 }
  0xce   : > { %v858_v40 = vshrl.u32 %v854_v56, 16  ;;  %vm1254_vm5 = vcmp.gt.s32.totalorder %v1253_v49, 0  ;;  %vm416_vm6 = vcmp.lt.s32.totalorder %v415_v51, 0  ;;  %v417_v35 = vsub.s32 0, %v415_v51 }
  0xcf   : > { %v838_v60 = vshrl.u32 %v833_v57, 16  ;;  %v847_v42 = vadd.s32 %v846_v55, %v836_v53  ;;  %v817_v45 = vsel %vm811_vm13, %v814_v27, %v816_v31  ;;  %v860_v33 = vshrl.u32 %v855_v1, 16 }
  0xd0   : > { %v869_v62 = vadd.s32 %v868_v58, %v858_v40  ;;  %v1255_v0 = vsel %vm1254_vm5, %v1253_v49, 0  ;;  %v418_v2 = vsel %vm416_vm6, %v417_v35, %v415_v51  ;;  %v2914_v6 = vadd.s32 %v863_v23, %v859_v13 }
  0xd1   : > { %v2912_v3 = vadd.s32 %v847_v42, %v838_v60  ;;  %v1251_v8 = vor.u32 8388608, %v1250_v28  ;;  %v419_v9 = vclz %v418_v2  ;;  %v438_v56 = vsel %vm315_vm4, %v437_v59, %v413_v25 }
  0xd2   : > { %v870_v10 = vadd.s32 %v869_v62, %v860_v33  ;;  %v1257_v38 = vand.u32 31, %v1255_v0  ;;  %vm2920_vm7 = vcmp.le.f32.partialorder %v313_v22, 0.7853982  ;;  %v407_v1 = vadd.s32 %v2862_v37, %v2860_v36 }
  0xd3   : > { %v871_v57 = vmul.u32 %v2769_v44, %v817_v45  ;;  %v2445_v11 = vadd.s32 4294967294, %v419_v9  ;;  %vm873_vm8 = vc.u32 %v2912_v3, %v2914_v6  ;;  %v440_v15 = vsel %vm2920_vm7, 0, %v438_v56 }
  0xd4   : > { %v874_v12 = vadd.s32 1, %v870_v10  ;;  %v1258_v13 = vsub.s32 32, %v1257_v38  ;;  %v2931_v16 = vshrl.u32 %v1255_v0, 5  ;;  %v1260_v22 = vshll.u32 %v2629_v46, %v1257_v38 }
  0xd5   : > { %v2934_v18 = vshll.u32 %v1251_v8, 8  ;;  %vm2446_vm9 = vcmp.lt.s32.totalorder %v2445_v11, 0  ;;  %v1263_v44 = vshll.u32 %v2630_v48, %v1257_v38  ;;  %v1266_v7 = vshll.u32 %v2631_v50, %v1257_v38 }
  0xd6   : > { %v875_v61 = vsel %vm873_vm8, %v874_v12, %v870_v10  ;;  %v1261_v36 = vshrl.u32 %v2630_v48, %v1258_v13  ;;  %v422_v37 = vsel %vm2446_vm9, 0, %v2445_v11  ;;  %v1264_v23 = vshrl.u32 %v2631_v50, %v1258_v13 }
  0xd7   : > { %v876_v19 = vadd.s32 %v875_v61, %v871_v57  ;;  %v423_v25 = vsub.s32 32, %v422_v37  ;;  %v427_v26 = vsub.s32 4294967266, %v422_v37  ;;  %v1267_v4 = vshrl.u32 %v2632_v52, %v1258_v13  ;;  %v304_v61 = vpop.f32.mrf.mxu3 }
  0xd8   : > { %v1269_v43 = vshll.u32 %v2632_v52, %v1257_v38  ;;  %v424_v14 = vshll.u32 %v415_v51, %v422_v37  ;;  %v1262_v29 = vor.u32 %v1261_v36, %v1260_v22  ;;  %v1270_v27 = vshrl.u32 %v2633_v54, %v1258_v13 }
  0xd9   : > { %v877_v28 = vadd.s32 536870912, %v876_v19  ;;  %v425_v30 = vshrl.u32 %v407_v1, %v423_v25  ;;  %v428_v31 = vadd.s32 127, %v427_v26  ;;  %v1265_v39 = vor.u32 %v1264_v23, %v1263_v44 }
  0xda   : > { %v1273_v47 = vshrl.u32 %v2634_v63, %v1258_v13  ;;  %v457_v49 = vadd.s32 3, %v440_v15  ;;  %v1271_v55 = vor.u32 %v1270_v27, %v1269_v43  ;;  %v1268_v40 = vor.u32 %v1267_v4, %v1266_v7 }
  0xdb   : > { %v878_v53 = vshrl.u32 %v877_v28, 30  ;;  %v426_v58 = vor.u32 %v425_v30, %v424_v14  ;;  %v429_v59 = vshll.u32 %v428_v31, 23  ;;  %v1272_v35 = vshll.u32 %v2633_v54, %v1257_v38 }
  0xdc   : > { %vm780_vm10 = vcmp.lt.s32.totalorder %v2750_v21, 0  ;;  %vm1275_vm11 = vcmp.lt.s32.totalorder %v2931_v16, 1  ;;  %v1292_v60 = vand.u32 65535, %v2934_v18  ;;  %v1293_v42 = vshrl.u32 %v2934_v18, 16 }
  0xdd   : > { %v879_v51 = vshll.u32 %v878_v53, 30  ;;  %v430_v45 = vor.u32 4788187, %v429_v59  ;;  %v1274_v33 = vor.u32 %v1273_v47, %v1272_v35  ;;  %vm1278_vm12 = vcmp.lt.s32.totalorder %v2931_v16, 4 }
  0xde   : > { %v1283_v62 = vsel %vm1275_vm11, %v1262_v29, %v1265_v39  ;;  %v2952_v0 = vand.u32 3, %v457_v49  ;;  %vm1277_vm13 = vcmp.lt.s32.totalorder %v2931_v16, 3  ;;  %v1284_v8 = vsel %vm1278_vm12, %v1271_v55, 920167782 }
  0xdf   : > { %v2954_v2 = vsub.s32 %v876_v19, %v879_v51  ;;  %v431_v9 = vand.u32 2147483647, %v430_v45  ;;  %v433_v56 = vcvt.s32.f32 %v426_v58  ;;  %vm1276_vm14 = vcmp.lt.s32.totalorder %v2931_v16, 2 }
  0xe0   : > { %v1285_v10 = vsel %vm1277_vm13, %v1268_v40, %v1284_v8  ;;  %v1259_v1 = vshrl.u32 %v2629_v46, %v1258_v13  ;;  %v902_v12 = vsub.s32 4, %v878_v53  ;;  %v1287_v15 = vsel %vm1275_vm11, %v1265_v39, %v1268_v40 }
  0xe1   : > { %vm881_vm15 = vcmp.lt.s32.totalorder %v2954_v2, 0  ;;  %v882_v38 = vsub.s32 0, %v2954_v2  ;;  %v1286_v57 = vsel %vm1276_vm14, %v1283_v62, %v1285_v10  ;;  %v434_v11 = vmul.f32 %v433_v56, %v431_v9 }
  0xe2   : > { %v1288_v22 = vsel %vm1278_vm12, %v1274_v33, 1326507024  ;;  %v1280_v44 = vsel %vm1278_vm12, %v1268_v40, 2102212464  ;;  %v1316_v37 = vand.u32 65535, %v1286_v57  ;;  %v1317_v25 = vshrl.u32 %v1286_v57, 16 }
  0xe3   : > { %v883_v36 = vsel %vm881_vm15, %v882_v38, %v2954_v2  ;;  %v1289_v13 = vsel %vm1277_vm13, %v1271_v55, %v1288_v22  ;;  %v435_v19 = vxor.u32 2147483648, %v434_v11  ;;  %v872_v26 = vadd.s32 %v2914_v6, %v2912_v3 }
  0xe4   : > { %v884_v23 = vclz %v883_v36  ;;  %v1290_v7 = vsel %vm1276_vm14, %v1287_v15, %v1289_v13  ;;  %v2982_v4 = vsel %vm1275_vm11, %v1259_v1, %v1262_v29  ;;  %v2985_v14 = vadd.f32 %v2744_v17, %v304_v61 }
  0xe5   : > { %v1294_v43 = vand.u32 65535, %v1290_v7  ;;  %v436_v28 = vsel %vm315_vm4, %v435_v19, %v434_v11  ;;  %v2991_v30 = vsel %vm780_vm10, %v902_v12, %v878_v53  ;;  %v1295_v31 = vshrl.u32 %v1290_v7, 16 }
  0xe6   : > { %v2454_v27 = vadd.s32 4294967294, %v884_v23  ;;  %v2996_v3 = vsel %vm2920_vm7, %v2747_v20, %v436_v28  ;;  %v3000_v6 = vsel %vm1277_vm13, %v1265_v39, %v1280_v44  ;;  %v1318_v47 = vmul.u32 %v1316_v37, %v1292_v60 }
  0xe7   : > { %v1298_v29 = vmul.u32 %v1294_v43, %v1293_v42  ;;  %v441_v49 = vmul.f32 %v2996_v3, %v2996_v3  ;;  %v1297_v55 = vmul.u32 %v1295_v31, %v1292_v60  ;;  %v3004_v58 = vmul.u32 %v1317_v25, %v1292_v60 }
  0xe8   : > { %vm2455_vm0 = vcmp.lt.s32.totalorder %v2454_v27, 0  ;;  %v1296_v59 = vmul.u32 %v1294_v43, %v1292_v60  ;;  %v1299_v40 = vmul.u32 %v1295_v31, %v1293_v42  ;;  %v3006_v35 = vmul.u32 %v1316_v37, %v1293_v42 }
  0xe9   : > { %v887_v53 = vsel %vm2455_vm0, 0, %v2454_v27  ;;  %v442_v34 = vmul.f32 -0.001358992, %v441_v49  ;;  %v449_v51 = vmul.f32 -0.00019511016, %v441_v49  ;;  %v1302_v33 = vshll.u32 %v1298_v29, 16 }
  0xea   : > { %v888_v45 = vsub.s32 32, %v887_v53  ;;  %v892_v39 = vsub.s32 4294967266, %v887_v53  ;;  %v1300_v62 = vshll.u32 %v1297_v55, 16  ;;  %v1303_v8 = vshrl.u32 %v1298_v29, 16 }
  0xeb   : > { %v1321_v9 = vmul.u32 %v1317_v25, %v1293_v42  ;;  %v443_v56 = vadd.f32 0.041655596, %v442_v34  ;;  %v450_v10 = vadd.f32 0.008332121, %v449_v51  ;;  %v889_v38 = vshll.u32 %v2954_v2, %v887_v53 }
  0xec   : > { %v890_v1 = vshrl.u32 %v872_v26, %v888_v45  ;;  %v893_v57 = vadd.s32 127, %v892_v39  ;;  %vm1304_vm1 = vc.u32 %v1296_v59, %v1300_v62  ;;  %v1306_v11 = vadd.s32 %v1300_v62, %v1296_v59 }
  0xed   : > { %v1322_v60 = vshll.u32 %v3004_v58, 16  ;;  %v444_v12 = vmul.f32 %v443_v56, %v441_v49  ;;  %v451_v15 = vmul.f32 %v450_v10, %v441_v49  ;;  %v1305_v61 = vsel %vm1304_vm1, 1, %v2635_v5 }
  0xee   : > { %v891_v22 = vor.u32 %v890_v1, %v889_v38  ;;  %vm3013_vm2 = vcmp.le.f32.partialorder %v778_v24, 0.7853982  ;;  %v894_v42 = vshll.u32 %v893_v57, 23  ;;  %v1301_v44 = vshrl.u32 %v1297_v55, 16 }
  0xef   : > { %v1307_v2 = vadd.s32 %v1305_v61, %v1299_v40  ;;  %vm1308_vm3 = vc.u32 %v1306_v11, %v1302_v33  ;;  %v445_v13 = vadd.f32 -0.4999988, %v444_v12  ;;  %v452_v37 = vadd.f32 -0.16666654, %v451_v15 }
  0xf0   : > { %v1309_v19 = vsel %vm1308_vm3, 1, %v2635_v5  ;;  %v1324_v23 = vshll.u32 %v3006_v35, 16  ;;  %vm460_vm4 = vcmp.eq.s32.totalorder %v2952_v0, 0  ;;  %v895_v7 = vor.u32 4788187, %v894_v42 }
  0xf1   : > { %v1311_v25 = vadd.s32 %v1309_v19, %v1307_v2  ;;  %vm1326_vm5 = vc.u32 %v1318_v47, %v1322_v60  ;;  %v1328_v26 = vadd.s32 %v1322_v60, %v1318_v47  ;;  %v446_v24 = vmul.f32 %v445_v13, %v441_v49 }
  0xf2   : > { %v453_v43 = vmul.f32 %v452_v37, %v441_v49  ;;  %vm459_vm6 = vcmp.lt.s32.totalorder %v2952_v0, 2  ;;  %v898_v28 = vcvt.s32.f32 %v891_v22  ;;  %v1327_v27 = vsel %vm1326_vm5, 1, %v2635_v5 }
  0xf3   : > { %vm456_vm7 = vweird.f32 %v2747_v20  ;;  %v896_v31 = vand.u32 2147483647, %v895_v7  ;;  %v1312_v29 = vadd.s32 %v1311_v25, %v1301_v44  ;;  %v1329_v55 = vadd.s32 %v1327_v27, %v1321_v9 }
  0xf4   : > { %vm1330_vm8 = vc.u32 %v1328_v26, %v1324_v23  ;;  %v447_v53 = vadd.f32 1.0, %v446_v24  ;;  %v454_v59 = vadd.f32 1.0, %v453_v43  ;;  %v1323_v40 = vshrl.u32 %v3004_v58, 16 }
  0xf5   : > { %v1331_v47 = vsel %vm1330_vm8, 1, %v2635_v5  ;;  %v899_v34 = vmul.f32 %v898_v28, %v896_v31  ;;  %v1313_v49 = vadd.s32 %v1312_v29, %v1303_v8  ;;  %v1863_v45 = vand.u32 2147483647, %v2985_v14 }
  0xf6   : > { %v1333_v51 = vadd.s32 %v1331_v47, %v1329_v55  ;;  %v455_v33 = vmul.f32 %v454_v59, %v2996_v3  ;;  %vm463_vm9 = vcmp.eq.s32.totalorder %v2952_v0, 2  ;;  %v464_v39 = vxor.u32 2147483648, %v447_v53  ;;  %v277_v0 = vpop.f32.mrf.mxu0 }
  0xf7   : > { %v1866_v62 = vand.u32 2139095040, %v2985_v14  ;;  %v900_v9 = vxor.u32 2147483648, %v899_v34  ;;  %v1325_v56 = vshrl.u32 %v3006_v35, 16  ;;  %v1332_v58 = vadd.s32 %v1328_v26, %v1324_v23 }
  0xf8   : > { %v1334_v10 = vadd.s32 %v1333_v51, %v1323_v40  ;;  %v461_v38 = vxor.u32 2147483648, %v455_v33  ;;  %v905_v8 = vsel %vm3013_vm2, 0, %v2991_v30  ;;  %v1282_v3 = vsel %vm1276_vm14, %v2982_v4, %v3000_v6 }
  0xf9   : > { %v1867_v1 = vshrl.u32 %v1866_v62, 23  ;;  %v901_v57 = vsel %vm780_vm10, %v900_v9, %v899_v34  ;;  %vm1338_vm11 = vc.u32 %v1313_v49, %v1332_v58  ;;  %v1870_v35 = vand.u32 8388607, %v1863_v45 }
  0xfa   : > { %v1335_v11 = vadd.s32 %v1334_v10, %v1325_v56  ;;  %v462_v60 = vsel %vm460_vm4, %v447_v53, %v461_v38  ;;  %v465_v30 = vsel %vm463_vm9, %v464_v39, %v455_v33  ;;  %v904_v16 = vsel %vm3013_vm2, %v2750_v21, %v901_v57 }
  0xfb   : > { %v2474_v4 = vadd.s32 4294967169, %v1867_v1  ;;  %v466_v6 = vsel %vm459_vm6, %v462_v60, %v465_v30  ;;  %v906_v12 = vmul.f32 %v904_v16, %v904_v16  ;;  %v922_v15 = vadd.s32 3, %v905_v8 }
  0xfc   : > { %v1339_v22 = vadd.s32 1, %v1335_v11  ;;  %v467_v61 = vsel %vm456_vm7, nan, %v466_v6  ;;  %v1336_v42 = vmul.u32 %v2934_v18, %v1282_v3  ;;  %v1871_v44 = vor.u32 8388608, %v1870_v35 }
  0xfd   : > { %v1873_v2 = vadd.s32 1, %v2474_v4  ;;  %2328 = vst [vmem:[%s3055_s24] sm:$0xff] %v467_v61  ;;  %v907_v36 = vmul.f32 -0.001358992, %v906_v12  ;;  %v914_v13 = vmul.f32 -0.00019511016, %v906_v12  ;;  %v923_v25 = vand.u32 3, %v922_v15 }
  0xfe   : > { %v1340_v37 = vsel %vm1338_vm11, %v1339_v22, %v1335_v11  ;;  %v3059_v18 = vshll.u32 %v1871_v44, 8  ;;  %v3062_v43 = vadd.f32 %v2744_v17, %v277_v0  ;;  %vm1245_vm12 = vcmp.lt.s32.totalorder %v2763_v41, 0 }
  0xff   : > { %v1341_v19 = vadd.s32 %v1340_v37, %v1336_v42  ;;  %vm1874_vm10 = vcmp.gt.s32.totalorder %v1873_v2, 0  ;;  %v908_v23 = vadd.f32 0.041655596, %v907_v36  ;;  %v915_v7 = vadd.f32 0.008332121, %v914_v13 }
 0x100   : > { %v1875_v20 = vsel %vm1874_vm10, %v1873_v2, 0  ;;  %vm928_vm13 = vcmp.eq.s32.totalorder %v923_v25, 2  ;;  %vm3069_vm14 = vcmp.le.f32.partialorder %v1243_v32, 0.7853982  ;;  %v3073_v40 = vadd.s32 %v1332_v58, %v1313_v49 }
 0x101   : > { %v1342_v26 = vadd.s32 536870912, %v1341_v19  ;;  %v1877_v24 = vand.u32 31, %v1875_v20  ;;  %v909_v28 = vmul.f32 %v908_v23, %v906_v12  ;;  %v916_v27 = vmul.f32 %v915_v7, %v906_v12 }
 0x102   : > { %v468_v17 = vand.u32 2147483647, %v3062_v43  ;;  %vm925_vm15 = vcmp.eq.s32.totalorder %v923_v25, 0  ;;  %v3078_v51 = vand.u32 65535, %v3059_v18  ;;  %v471_v33 = vand.u32 2139095040, %v3062_v43 }
 0x103   : > { %v1343_v31 = vshrl.u32 %v1342_v26, 30  ;;  %v3065_v29 = vsub.s32 32, %v1877_v24  ;;  %v910_v55 = vadd.f32 -0.4999988, %v909_v28  ;;  %v917_v53 = vadd.f32 -0.16666654, %v916_v27 }
 0x104   : > { %v1880_v34 = vshll.u32 %v2629_v46, %v1877_v24  ;;  %vm924_vm0 = vcmp.lt.s32.totalorder %v923_v25, 2  ;;  %vm921_vm1 = vweird.f32 %v2750_v21  ;;  %v3084_v56 = vshrl.u32 %v1875_v20, 5 }
 0x105   : > { %v1344_v47 = vshll.u32 %v1343_v31, 30  ;;  %v911_v39 = vmul.f32 %v910_v55, %v906_v12  ;;  %v918_v62 = vmul.f32 %v917_v53, %v906_v12  ;;  %v1367_v32 = vsub.s32 4, %v1343_v31 }
 0x106   : > { %v1881_v9 = vshrl.u32 %v2630_v48, %v3065_v29  ;;  %v1883_v58 = vshll.u32 %v2630_v48, %v1877_v24  ;;  %v1884_v10 = vshrl.u32 %v2631_v50, %v3065_v29  ;;  %v1889_v3 = vshll.u32 %v2632_v52, %v1877_v24 }
 0x107   : > { %v1345_v49 = vsub.s32 %v1341_v19, %v1344_v47  ;;  %v912_v38 = vadd.f32 1.0, %v911_v39  ;;  %v919_v8 = vadd.f32 1.0, %v918_v62  ;;  %v1890_v1 = vshrl.u32 %v2633_v54, %v3065_v29 }
 0x108   : > { %v1886_v11 = vshll.u32 %v2631_v50, %v1877_v24  ;;  %v1887_v35 = vshrl.u32 %v2632_v52, %v3065_v29  ;;  %v1368_v4 = vsel %vm1245_vm12, %v1367_v32, %v1343_v31  ;;  %v1882_v6 = vor.u32 %v1881_v9, %v1880_v34 }
 0x109   : > { %vm1346_vm2 = vcmp.lt.s32.totalorder %v1345_v49, 0  ;;  %v1347_v57 = vsub.s32 0, %v1345_v49  ;;  %v920_v60 = vmul.f32 %v919_v8, %v904_v16  ;;  %v929_v30 = vxor.u32 2147483648, %v912_v38 }
 0x10a   : > { %v1885_v15 = vor.u32 %v1884_v10, %v1883_v58  ;;  %v1892_v22 = vshll.u32 %v2633_v54, %v1877_v24  ;;  %v1893_v61 = vshrl.u32 %v2634_v63, %v3065_v29  ;;  %v1891_v2 = vor.u32 %v1890_v1, %v1889_v3 }
 0x10b   : > { %v1348_v12 = vsel %vm1346_vm2, %v1347_v57, %v1345_v49  ;;  %v926_v42 = vxor.u32 2147483648, %v920_v60  ;;  %vm1895_vm3 = vcmp.lt.s32.totalorder %v3084_v56, 1  ;;  %v930_v36 = vsel %vm928_vm13, %v929_v30, %v920_v60 }
 0x10c   : > { %v1349_v44 = vclz %v1348_v12  ;;  %v1370_v16 = vsel %vm3069_vm14, 0, %v1368_v4  ;;  %v1888_v13 = vor.u32 %v1887_v35, %v1886_v11  ;;  %v1913_v37 = vshrl.u32 %v3059_v18, 16 }
 0x10d   : > { %v927_v0 = vsel %vm925_vm15, %v912_v38, %v926_v42  ;;  %vm1897_vm4 = vcmp.lt.s32.totalorder %v3084_v56, 3  ;;  %vm1898_vm5 = vcmp.lt.s32.totalorder %v3084_v56, 4  ;;  %v1894_v7 = vor.u32 %v1893_v61, %v1892_v22 }
 0x10e   : > { %v2463_v19 = vadd.s32 4294967294, %v1349_v44  ;;  %v931_v23 = vsel %vm924_vm0, %v927_v0, %v930_v36  ;;  %vm1896_vm6 = vcmp.lt.s32.totalorder %v3084_v56, 2  ;;  %v1903_v20 = vsel %vm1895_vm3, %v1882_v6, %v1885_v15 }
 0x10f   : > { %v932_v26 = vsel %vm921_vm1, nan, %v931_v23  ;;  %v1904_v24 = vsel %vm1898_vm5, %v1891_v2, 920167782  ;;  %v472_v28 = vshrl.u32 %v471_v33, 23  ;;  %v1387_v31 = vadd.s32 3, %v1370_v16 }
 0x110   : > { %vm2464_vm7 = vcmp.lt.s32.totalorder %v2463_v19, 0  ;;  %2331 = vst [vmem:[%s3055_s24 + $0x18] sm:$0xff] %v932_v26  ;;  %v1905_v25 = vsel %vm1897_vm4, %v1888_v13, %v1904_v24  ;;  %v3121_v55 = vand.u32 8388607, %v468_v17  ;;  %v1907_v34 = vsel %vm1895_vm3, %v1885_v15, %v1888_v13 }
 0x111   : > { %v1352_v27 = vsel %vm2464_vm7, 0, %v2463_v19  ;;  %v1906_v21 = vsel %vm1896_vm6, %v1903_v20, %v1905_v25  ;;  %v1879_v33 = vshrl.u32 %v2629_v46, %v3065_v29  ;;  %v1908_v39 = vsel %vm1898_vm5, %v1894_v7, 1326507024 }
 0x112   : > { %v1353_v53 = vsub.s32 32, %v1352_v27  ;;  %v1357_v47 = vsub.s32 4294967266, %v1352_v27  ;;  %v1936_v62 = vand.u32 65535, %v1906_v21  ;;  %v1937_v32 = vshrl.u32 %v1906_v21, 16 }
 0x113   : > { %v1354_v9 = vshll.u32 %v1345_v49, %v1352_v27  ;;  %v1909_v38 = vsel %vm1897_vm4, %v1891_v2, %v1908_v39  ;;  %v3134_v8 = vand.u32 3, %v1387_v31  ;;  %v1900_v3 = vsel %vm1898_vm5, %v1888_v13, 2102212464 }
 0x114   : > { %v1355_v58 = vshrl.u32 %v3073_v40, %v1353_v53  ;;  %v1358_v10 = vadd.s32 127, %v1357_v47  ;;  %v1910_v29 = vsel %vm1896_vm6, %v1907_v34, %v1909_v38  ;;  %v1939_v1 = vmul.u32 %v1937_v32, %v3078_v51 }
 0x115   : > { %v1914_v35 = vand.u32 65535, %v1910_v29  ;;  %v1915_v49 = vshrl.u32 %v1910_v29, 16  ;;  %v1899_v40 = vsel %vm1895_vm3, %v1879_v33, %v1882_v6  ;;  %v1938_v60 = vmul.u32 %v1936_v62, %v3078_v51 }
 0x116   : > { %v1356_v57 = vor.u32 %v1355_v58, %v1354_v9  ;;  %v1359_v11 = vshll.u32 %v1358_v10, 23  ;;  %v1940_v30 = vmul.u32 %v1936_v62, %v1913_v37  ;;  %v1942_v4 = vshll.u32 %v1939_v1, 16 }
 0x117   : > { %v1901_v22 = vsel %vm1897_vm4, %v1885_v15, %v1900_v3  ;;  %v1917_v61 = vmul.u32 %v1915_v49, %v3078_v51  ;;  %v2447_v42 = vadd.s32 4294967169, %v472_v28  ;;  %v1918_v2 = vmul.u32 %v1914_v35, %v1913_v37 }
 0x118   : > { %v1360_v12 = vor.u32 4788187, %v1359_v11  ;;  %v1363_v44 = vcvt.s32.f32 %v1356_v57  ;;  %v1941_v36 = vmul.u32 %v1937_v32, %v1913_v37  ;;  %vm1946_vm8 = vc.u32 %v1938_v60, %v1942_v4 }
 0x119   : > { %v1916_v13 = vmul.u32 %v1914_v35, %v3078_v51  ;;  %v1920_v0 = vshll.u32 %v1917_v61, 16  ;;  %v1947_v6 = vsel %vm1946_vm8, 1, %v2635_v5  ;;  %v1919_v19 = vmul.u32 %v1915_v49, %v1913_v37 }
 0x11a   : > { %v1361_v16 = vand.u32 2147483647, %v1360_v12  ;;  %v1944_v23 = vshll.u32 %v1940_v30, 16  ;;  %v1948_v7 = vadd.s32 %v1942_v4, %v1938_v60  ;;  %v1949_v20 = vadd.s32 %v1947_v6, %v1941_v36 }
 0x11b   : > { %v1922_v24 = vshll.u32 %v1918_v2, 16  ;;  %vm1924_vm9 = vc.u32 %v1916_v13, %v1920_v0  ;;  %v1926_v15 = vadd.s32 %v1920_v0, %v1916_v13  ;;  %v1902_v28 = vsel %vm1896_vm6, %v1899_v40, %v1901_v22 }
 0x11c   : > { %v1364_v26 = vmul.f32 %v1363_v44, %v1361_v16  ;;  %v1925_v27 = vsel %vm1924_vm9, 1, %v2635_v5  ;;  %vm1950_vm11 = vc.u32 %v1948_v7, %v1944_v23  ;;  %v478_v31 = vadd.s32 1, %v2447_v42 }
 0x11d   : > { %v1927_v51 = vadd.s32 %v1925_v27, %v1919_v19  ;;  %vm1928_vm10 = vc.u32 %v1926_v15, %v1922_v24  ;;  %v1951_v53 = vsel %vm1950_vm11, 1, %v2635_v5  ;;  %v1943_v47 = vshrl.u32 %v1939_v1, 16 }
 0x11e   : > { %v1365_v25 = vxor.u32 2147483648, %v1364_v26  ;;  %v1929_v37 = vsel %vm1928_vm10, 1, %v2635_v5  ;;  %v1953_v21 = vadd.s32 %v1951_v53, %v1949_v20  ;;  %vm479_vm13 = vcmp.gt.s32.totalorder %v478_v31, 0 }
 0x11f   : > { %v1921_v33 = vshrl.u32 %v1917_v61, 16  ;;  %v1931_v56 = vadd.s32 %v1929_v37, %v1927_v51  ;;  %v480_v39 = vsel %vm479_vm13, %v478_v31, 0  ;;  %v1945_v32 = vshrl.u32 %v1940_v30, 16 }
 0x120   : > { %v1366_v34 = vsel %vm1245_vm12, %v1365_v25, %v1364_v26  ;;  %v1954_v9 = vadd.s32 %v1953_v21, %v1943_v47  ;;  %v482_v58 = vand.u32 31, %v480_v39  ;;  %v1923_v38 = vshrl.u32 %v1918_v2, 16 }
 0x121   : > { %v1369_v62 = vsel %vm3069_vm14, %v2763_v41, %v1366_v34  ;;  %v1932_v3 = vadd.s32 %v1931_v56, %v1921_v33  ;;  %v1956_v29 = vmul.u32 %v3059_v18, %v1902_v28  ;;  %v476_v57 = vor.u32 8388608, %v3121_v55 }
 0x122   : > { %v1371_v10 = vmul.f32 %v1369_v62, %v1369_v62  ;;  %v1955_v1 = vadd.s32 %v1954_v9, %v1945_v32  ;;  %v3161_v11 = vsub.s32 32, %v482_v58  ;;  %v485_v35 = vshll.u32 %v2629_v46, %v482_v58 }
 0x123   : > { %v3164_v60 = vadd.s32 %v1932_v3, %v1923_v38  ;;  %v3166_v59 = vadd.s32 %v1948_v7, %v1944_v23  ;;  %v488_v12 = vshll.u32 %v2630_v48, %v482_v58  ;;  %v491_v61 = vshll.u32 %v2631_v50, %v482_v58 }
 0x124   : > { %v1372_v49 = vmul.f32 -0.001358992, %v1371_v10  ;;  %v1379_v40 = vmul.f32 -0.00019511016, %v1371_v10  ;;  %v1959_v30 = vadd.s32 1, %v1955_v1  ;;  %v486_v4 = vshrl.u32 %v2630_v48, %v3161_v11 }
 0x125   : > { %v489_v18 = vshrl.u32 %v2631_v50, %v3161_v11  ;;  %vm1958_vm12 = vc.u32 %v3164_v60, %v3166_v59  ;;  %v3176_v44 = vshrl.u32 %v480_v39, 5  ;;  %v492_v36 = vshrl.u32 %v2632_v52, %v3161_v11 }
 0x126   : > { %v1373_v55 = vadd.f32 0.041655596, %v1372_v49  ;;  %v1380_v22 = vadd.f32 0.008332121, %v1379_v40  ;;  %v1960_v42 = vsel %vm1958_vm12, %v1959_v30, %v1955_v1  ;;  %v3178_v2 = vor.u32 %v486_v4, %v485_v35 }
 0x127   : > { %v1961_v0 = vadd.s32 %v1960_v42, %v1956_v29  ;;  %v494_v6 = vshll.u32 %v2632_v52, %v482_v58  ;;  %v3183_v19 = vor.u32 %v489_v18, %v488_v12  ;;  %v495_v23 = vshrl.u32 %v2633_v54, %v3161_v11 }
 0x128   : > { %v1374_v16 = vmul.f32 %v1373_v55, %v1371_v10  ;;  %v1381_v13 = vmul.f32 %v1380_v22, %v1371_v10  ;;  %v497_v7 = vshll.u32 %v2633_v54, %v482_v58  ;;  %v498_v20 = vshrl.u32 %v2634_v63, %v3161_v11 }
 0x129   : > { %v1962_v15 = vadd.s32 536870912, %v1961_v0  ;;  %v3190_v28 = vor.u32 %v492_v36, %v491_v61  ;;  %v496_v27 = vor.u32 %v495_v23, %v494_v6  ;;  %vm500_vm14 = vcmp.lt.s32.totalorder %v3176_v44, 1 }
 0x12a   : > { %v1375_v26 = vadd.f32 -0.4999988, %v1374_v16  ;;  %v1382_v24 = vadd.f32 -0.16666654, %v1381_v13  ;;  %v499_v31 = vor.u32 %v498_v20, %v497_v7  ;;  %vm502_vm15 = vcmp.lt.s32.totalorder %v3176_v44, 3 }
 0x12b   : > { %v3194_v53 = vshrl.u32 %v1962_v15, 30  ;;  %vm503_vm0 = vcmp.lt.s32.totalorder %v3176_v44, 4  ;;  %vm1386_vm1 = vweird.f32 %v2763_v41  ;;  %v3200_v47 = vshll.u32 %v476_v57, 8 }
 0x12c   : > { %v1376_v25 = vmul.f32 %v1375_v26, %v1371_v10  ;;  %v1383_v51 = vmul.f32 %v1382_v24, %v1371_v10  ;;  %v509_v37 = vsel %vm503_vm0, %v496_v27, 920167782  ;;  %vm1389_vm2 = vcmp.lt.s32.totalorder %v3134_v8, 2 }
 0x12d   : > { %v1964_v33 = vshll.u32 %v3194_v53, 30  ;;  %vm501_vm3 = vcmp.lt.s32.totalorder %v3176_v44, 2  ;;  %v508_v56 = vsel %vm500_vm14, %v3178_v2, %v3183_v19  ;;  %v510_v39 = vsel %vm502_vm15, %v3190_v28, %v509_v37 }
 0x12e   : > { %v1377_v21 = vadd.f32 1.0, %v1376_v25  ;;  %v1384_v34 = vadd.f32 1.0, %v1383_v51  ;;  %v513_v32 = vsel %vm503_vm0, %v499_v31, 1326507024  ;;  %v512_v38 = vsel %vm500_vm14, %v3183_v19, %v3190_v28 }
 0x12f   : > { %v1965_v10 = vsub.s32 %v1961_v0, %v1964_v33  ;;  %vm1393_vm4 = vcmp.eq.s32.totalorder %v3134_v8, 2  ;;  %v514_v3 = vsel %vm502_vm15, %v496_v27, %v513_v32  ;;  %v517_v29 = vand.u32 65535, %v3200_v47 }
 0x130   : > { %v1385_v9 = vmul.f32 %v1384_v34, %v1369_v62  ;;  %v1394_v58 = vxor.u32 2147483648, %v1377_v21  ;;  %v518_v1 = vshrl.u32 %v3200_v47, 16  ;;  %v511_v62 = vsel %vm501_vm3, %v508_v56, %v510_v39 }
 0x131   : > { %vm1966_vm5 = vcmp.lt.s32.totalorder %v1965_v10, 0  ;;  %v1967_v35 = vsub.s32 0, %v1965_v10  ;;  %vm1390_vm6 = vcmp.eq.s32.totalorder %v3134_v8, 0  ;;  %v484_v40 = vshrl.u32 %v2629_v46, %v3161_v11 }
 0x132   : > { %v1391_v57 = vxor.u32 2147483648, %v1385_v9  ;;  %v1395_v49 = vsel %vm1393_vm4, %v1394_v58, %v1385_v9  ;;  %v515_v30 = vsel %vm501_vm3, %v512_v38, %v514_v3  ;;  %v541_v42 = vand.u32 65535, %v511_v62  ;;  %v286_v38 = vpop.f32.mrf.mxu1 }
 0x133   : > { %v1968_v12 = vsel %vm1966_vm5, %v1967_v35, %v1965_v10  ;;  %v519_v18 = vand.u32 65535, %v515_v30  ;;  %v520_v55 = vshrl.u32 %v515_v30, 16  ;;  %v542_v36 = vshrl.u32 %v511_v62, 16 }
 0x134   : > { %v1392_v4 = vsel %vm1390_vm6, %v1377_v21, %v1391_v57  ;;  %v1969_v61 = vclz %v1968_v12  ;;  %v1957_v23 = vadd.s32 %v3166_v59, %v3164_v60  ;;  %v504_v7 = vsel %vm500_vm14, %v484_v40, %v3178_v2 }
 0x135   : > { %v1396_v22 = vsel %vm1389_vm2, %v1392_v4, %v1395_v49  ;;  %v521_v13 = vmul.u32 %v519_v18, %v517_v29  ;;  %v522_v0 = vmul.u32 %v520_v55, %v517_v29  ;;  %v523_v6 = vmul.u32 %v519_v18, %v518_v1  ;;  %v3252_v4 = vld [vmem:[%s4238_s2] ss:$0 sm:$0xff] }
 0x136   : > { %v1397_v16 = vsel %vm1386_vm1, nan, %v1396_v22  ;;  %v2475_v11 = vadd.s32 4294967294, %v1969_v61  ;;  %v543_v26 = vmul.u32 %v541_v42, %v517_v29  ;;  %v544_v24 = vmul.u32 %v542_v36, %v517_v29 }
 0x137   : > { %2334 = vst [vmem:[%s3055_s24 + $0x30] sm:$0xff] %v1397_v16  ;;  %v525_v8 = vshll.u32 %v522_v0, 16  ;;  %v527_v20 = vshll.u32 %v523_v6, 16  ;;  %v545_v15 = vmul.u32 %v541_v42, %v518_v1  ;;  %v524_v27 = vmul.u32 %v520_v55, %v518_v1 }
 0x138   : > { %vm2476_vm7 = vcmp.lt.s32.totalorder %v2475_v11, 0  ;;  %vm1865_vm9 = vcmp.lt.s32.totalorder %v2985_v14, 0  ;;  %v526_v37 = vshrl.u32 %v522_v0, 16  ;;  %v547_v2 = vshll.u32 %v544_v24, 16 }
 0x139   : > { %v1972_v41 = vsel %vm2476_vm7, 0, %v2475_v11  ;;  %vm529_vm8 = vc.u32 %v521_v13, %v525_v8  ;;  %v531_v31 = vadd.s32 %v525_v8, %v521_v13  ;;  %v549_v39 = vshll.u32 %v545_v15, 16 }
 0x13a   : > { %v1973_v25 = vsub.s32 32, %v1972_v41  ;;  %v1977_v51 = vsub.s32 4294967266, %v1972_v41  ;;  %v530_v60 = vsel %vm529_vm8, 1, %v2635_v5  ;;  %v1974_v59 = vshll.u32 %v1965_v10, %v1972_v41 }
 0x13b   : > { %v532_v21 = vadd.s32 %v530_v60, %v524_v27  ;;  %vm533_vm11 = vc.u32 %v531_v31, %v527_v20  ;;  %v546_v9 = vmul.u32 %v542_v36, %v518_v1  ;;  %vm551_vm10 = vc.u32 %v543_v26, %v547_v2 }
 0x13c   : > { %v1975_v34 = vshrl.u32 %v1957_v23, %v1973_v25  ;;  %v1978_v33 = vadd.s32 127, %v1977_v51  ;;  %v534_v56 = vsel %vm533_vm11, 1, %v2635_v5  ;;  %v553_v58 = vadd.s32 %v547_v2, %v543_v26 }
 0x13d   : > { %v536_v32 = vadd.s32 %v534_v56, %v532_v21  ;;  %v505_v57 = vsel %vm503_vm0, %v3190_v28, 2102212464  ;;  %v552_v10 = vsel %vm551_vm10, 1, %v2635_v5  ;;  %v1987_v35 = vsub.s32 4, %v3194_v53  ;;  %v295_v28 = vpop.f32.mrf.mxu2 }
 0x13e   : > { %v1976_v3 = vor.u32 %v1975_v34, %v1974_v59  ;;  %v1979_v29 = vshll.u32 %v1978_v33, 23  ;;  %v554_v49 = vadd.s32 %v552_v10, %v546_v9  ;;  %vm555_vm13 = vc.u32 %v553_v58, %v549_v39 }
 0x13f   : > { %v537_v62 = vadd.s32 %v536_v32, %v526_v37  ;;  %v528_v30 = vshrl.u32 %v523_v6, 16  ;;  %v556_v1 = vsel %vm555_vm13, 1, %v2635_v5  ;;  %v3255_v12 = vadd.f32 %v3252_v4, %v286_v38 }
 0x140   : > { %v1980_v40 = vor.u32 4788187, %v1979_v29  ;;  %v1983_v18 = vcvt.s32.f32 %v1976_v3  ;;  %v506_v55 = vsel %vm502_vm15, %v3183_v19, %v505_v57  ;;  %v548_v22 = vshrl.u32 %v544_v24, 16 }
 0x141   : > { %v558_v61 = vadd.s32 %v556_v1, %v554_v49  ;;  %v538_v36 = vadd.s32 %v537_v62, %v528_v30  ;;  %v933_v16 = vand.u32 2147483647, %v3255_v12  ;;  %v936_v13 = vand.u32 2139095040, %v3255_v12 }
 0x142   : > { %v1981_v42 = vand.u32 2147483647, %v1980_v40  ;;  %v1988_v0 = vsel %vm1865_vm9, %v1987_v35, %v3194_v53  ;;  %v550_v6 = vshrl.u32 %v545_v15, 16  ;;  %v3266_v23 = vadd.f32 %v3252_v4, %v295_v28 }
 0x143   : > { %v559_v11 = vadd.s32 %v558_v61, %v548_v22  ;;  %v557_v20 = vadd.s32 %v553_v58, %v549_v39  ;;  %v937_v19 = vshrl.u32 %v936_v13, 23  ;;  %v940_v26 = vand.u32 8388607, %v933_v16 }
 0x144   : > { %v1984_v8 = vmul.f32 %v1983_v18, %v1981_v42  ;;  %v507_v24 = vsel %vm501_vm3, %v504_v7, %v506_v55  ;;  %vm1864_vm12 = vcmp.le.f32.partialorder %v1863_v45, 0.7853982  ;;  %v1401_v25 = vand.u32 2139095040, %v3266_v23 }
 0x145   : > { %v560_v41 = vadd.s32 %v559_v11, %v550_v6  ;;  %vm563_vm14 = vc.u32 %v538_v36, %v557_v20  ;;  %v2456_v53 = vadd.s32 4294967169, %v937_v19  ;;  %v1990_v15 = vsel %vm1864_vm12, 0, %v1988_v0 }
 0x146   : > { %v1985_v27 = vxor.u32 2147483648, %v1984_v8  ;;  %v561_v37 = vmul.u32 %v3200_v47, %v507_v24  ;;  %v941_v60 = vor.u32 8388608, %v940_v26  ;;  %v2007_v2 = vadd.s32 3, %v1990_v15 }
 0x147   : > { %v564_v31 = vadd.s32 1, %v560_v41  ;;  %v943_v59 = vadd.s32 1, %v2456_v53  ;;  %v1398_v33 = vand.u32 2147483647, %v3266_v23  ;;  %v1402_v56 = vshrl.u32 %v1401_v25, 23 }
 0x148   : > { %v1986_v51 = vsel %vm1865_vm9, %v1985_v27, %v1984_v8  ;;  %v3280_v58 = vshll.u32 %v941_v60, 8  ;;  %vm470_vm0 = vcmp.lt.s32.totalorder %v3062_v43, 0  ;;  %v3283_v29 = vand.u32 3, %v2007_v2 }
 0x149   : > { %v1989_v44 = vsel %vm1864_vm12, %v2985_v14, %v1986_v51  ;;  %v565_v7 = vsel %vm563_vm14, %v564_v31, %v560_v41  ;;  %vm944_vm15 = vcmp.gt.s32.totalorder %v943_v59, 0  ;;  %v3285_v10 = vadd.s32 %v557_v20, %v538_v36 }
 0x14a   : > { %v1991_v21 = vmul.f32 %v1989_v44, %v1989_v44  ;;  %v566_v45 = vadd.s32 %v565_v7, %v561_v37  ;;  %v945_v34 = vsel %vm944_vm15, %v943_v59, 0  ;;  %v2465_v62 = vadd.s32 4294967169, %v1402_v56 }
 0x14b   : > { %v947_v47 = vand.u32 31, %v945_v34  ;;  %v3289_v49 = vand.u32 8388607, %v1398_v33  ;;  %v3292_v28 = vand.u32 65535, %v3280_v58  ;;  %vm3296_vm1 = vcmp.le.f32.partialorder %v468_v17, 0.7853982 }
 0x14c   : > { %v1992_v39 = vmul.f32 -0.001358992, %v1991_v21  ;;  %v1999_v32 = vmul.f32 -0.00019511016, %v1991_v21  ;;  %v567_v9 = vadd.s32 536870912, %v566_v45  ;;  %vm2010_vm2 = vcmp.eq.s32.totalorder %v3283_v29, 0 }
 0x14d   : > { %v948_v35 = vsub.s32 32, %v947_v47  ;;  %v950_v22 = vshll.u32 %v2629_v46, %v947_v47  ;;  %v953_v42 = vshll.u32 %v2630_v48, %v947_v47  ;;  %vm2013_vm3 = vcmp.eq.s32.totalorder %v3283_v29, 2 }
 0x14e   : > { %v1993_v38 = vadd.f32 0.041655596, %v1992_v39  ;;  %v2000_v3 = vadd.f32 0.008332121, %v1999_v32  ;;  %v568_v57 = vshrl.u32 %v567_v9, 30  ;;  %v3308_v17 = vshrl.u32 %v945_v34, 5 }
 0x14f   : > { %v951_v61 = vshrl.u32 %v2630_v48, %v948_v35  ;;  %v954_v6 = vshrl.u32 %v2631_v50, %v948_v35  ;;  %v956_v11 = vshll.u32 %v2631_v50, %v947_v47  ;;  %v957_v8 = vshrl.u32 %v2632_v52, %v948_v35 }
 0x150   : > { %v1994_v40 = vmul.f32 %v1993_v38, %v1991_v21  ;;  %v2001_v30 = vmul.f32 %v2000_v3, %v1991_v21  ;;  %v569_v1 = vshll.u32 %v568_v57, 30  ;;  %v592_v55 = vsub.s32 4, %v568_v57 }
 0x151   : > { %v3313_v20 = vshrl.u32 %v3280_v58, 16  ;;  %vm2009_vm4 = vcmp.lt.s32.totalorder %v3283_v29, 2  ;;  %vm2006_vm6 = vweird.f32 %v2985_v14  ;;  %v952_v27 = vor.u32 %v951_v61, %v950_v22 }
 0x152   : > { %v1995_v36 = vadd.f32 -0.4999988, %v1994_v40  ;;  %v2002_v13 = vadd.f32 -0.16666654, %v2001_v30  ;;  %v3303_v0 = vsub.s32 %v566_v45, %v569_v1  ;;  %v593_v41 = vsel %vm470_vm0, %v592_v55, %v568_v57 }
 0x153   : > { %v959_v53 = vshll.u32 %v2632_v52, %v947_v47  ;;  %v960_v15 = vshrl.u32 %v2633_v54, %v948_v35  ;;  %v955_v37 = vor.u32 %v954_v6, %v953_v42  ;;  %v962_v7 = vshll.u32 %v2633_v54, %v947_v47 }
 0x154   : > { %v1996_v19 = vmul.f32 %v1995_v36, %v1991_v21  ;;  %v2003_v26 = vmul.f32 %v2002_v13, %v1991_v21  ;;  %vm571_vm5 = vcmp.lt.s32.totalorder %v3303_v0, 0  ;;  %v572_v24 = vsub.s32 0, %v3303_v0 }
 0x155   : > { %v961_v59 = vor.u32 %v960_v15, %v959_v53  ;;  %v963_v21 = vshrl.u32 %v2634_v63, %v948_v35  ;;  %v958_v34 = vor.u32 %v957_v8, %v956_v11  ;;  %vm965_vm7 = vcmp.lt.s32.totalorder %v3308_v17, 1 }
 0x156   : > { %v1997_v31 = vadd.f32 1.0, %v1996_v19  ;;  %v2004_v25 = vadd.f32 1.0, %v2003_v26  ;;  %v573_v51 = vsel %vm571_vm5, %v572_v24, %v3303_v0  ;;  %v949_v39 = vshrl.u32 %v2629_v46, %v948_v35 }
 0x157   : > { %v574_v60 = vclz %v573_v51  ;;  %vm967_vm8 = vcmp.lt.s32.totalorder %v3308_v17, 3  ;;  %v1408_v32 = vadd.s32 1, %v2465_v62  ;;  %v595_v38 = vsel %vm3296_vm1, 0, %v593_v41 }
 0x158   : > { %v2005_v2 = vmul.f32 %v2004_v25, %v1989_v44  ;;  %v2014_v45 = vxor.u32 2147483648, %v1997_v31  ;;  %vm966_vm9 = vcmp.lt.s32.totalorder %v3308_v17, 2  ;;  %vm968_vm11 = vcmp.lt.s32.totalorder %v3308_v17, 4 }
 0x159   : > { %v2448_v56 = vadd.s32 4294967294, %v574_v60  ;;  %v964_v44 = vor.u32 %v963_v21, %v962_v7  ;;  %v973_v47 = vsel %vm965_vm7, %v952_v27, %v955_v37  ;;  %v974_v3 = vsel %vm968_vm11, %v961_v59, 920167782 }
 0x15a   : > { %v2011_v9 = vxor.u32 2147483648, %v2005_v2  ;;  %v2015_v35 = vsel %vm2013_vm3, %v2014_v45, %v2005_v2  ;;  %v975_v40 = vsel %vm967_vm8, %v958_v34, %v974_v3  ;;  %v970_v22 = vsel %vm968_vm11, %v958_v34, 2102212464 }
 0x15b   : > { %vm2449_vm10 = vcmp.lt.s32.totalorder %v2448_v56, 0  ;;  %v976_v36 = vsel %vm966_vm9, %v973_v47, %v975_v40  ;;  %v977_v13 = vsel %vm965_vm7, %v955_v37, %v958_v34  ;;  %v978_v11 = vsel %vm968_vm11, %v964_v44, 1326507024 }
 0x15c   : > { %v2012_v57 = vsel %vm2010_vm2, %v1997_v31, %v2011_v9  ;;  %v577_v62 = vsel %vm2449_vm10, 0, %v2448_v56  ;;  %v1006_v8 = vand.u32 65535, %v976_v36  ;;  %v969_v14 = vsel %vm965_vm7, %v949_v39, %v952_v27 }
 0x15d   : > { %v2016_v30 = vsel %vm2009_vm4, %v2012_v57, %v2015_v35  ;;  %v578_v1 = vsub.s32 32, %v577_v62  ;;  %v582_v55 = vsub.s32 4294967266, %v577_v62  ;;  %v579_v42 = vshll.u32 %v3303_v0, %v577_v62 }
 0x15e   : > { %v2017_v61 = vsel %vm2006_vm6, nan, %v2016_v30  ;;  %v971_v0 = vsel %vm967_vm8, %v955_v37, %v970_v22  ;;  %v979_v19 = vsel %vm967_vm8, %v961_v59, %v978_v11  ;;  %v1007_v26 = vshrl.u32 %v976_v36, 16 }
 0x15f   : > { %2338 = vst [vmem:[%s3055_s24 + $0x50] sm:$0xff] %v2017_v61  ;;  %v580_v29 = vshrl.u32 %v3285_v10, %v578_v1  ;;  %v583_v6 = vadd.s32 127, %v582_v55  ;;  %v980_v10 = vsel %vm966_vm9, %v977_v13, %v979_v19  ;;  %vm1409_vm13 = vcmp.gt.s32.totalorder %v1408_v32, 0 }
 0x160   : > { %v984_v53 = vand.u32 65535, %v980_v10  ;;  %v985_v15 = vshrl.u32 %v980_v10, 16  ;;  %v1009_v31 = vmul.u32 %v1007_v26, %v3292_v28  ;;  %v1010_v25 = vmul.u32 %v1006_v8, %v3313_v20 }
 0x161   : > { %v581_v24 = vor.u32 %v580_v29, %v579_v42  ;;  %v584_v41 = vshll.u32 %v583_v6, 23  ;;  %v3368_v51 = vadd.s32 3, %v595_v38  ;;  %v3372_v37 = vsel %vm966_vm9, %v969_v14, %v971_v0 }
 0x162   : > { %v1008_v60 = vmul.u32 %v1006_v8, %v3292_v28  ;;  %v986_v59 = vmul.u32 %v984_v53, %v3292_v28  ;;  %v987_v7 = vmul.u32 %v985_v15, %v3292_v28  ;;  %v988_v21 = vmul.u32 %v984_v53, %v3313_v20 }
 0x163   : > { %v585_v27 = vor.u32 4788187, %v584_v41  ;;  %v1410_v2 = vsel %vm1409_vm13, %v1408_v32, 0  ;;  %v588_v34 = vcvt.s32.f32 %v581_v24  ;;  %v1012_v56 = vshll.u32 %v1009_v31, 16 }
 0x164   : > { %v1014_v39 = vshll.u32 %v1010_v25, 16  ;;  %v990_v9 = vshll.u32 %v987_v7, 16  ;;  %v992_v38 = vshll.u32 %v988_v21, 16  ;;  %v1011_v44 = vmul.u32 %v1007_v26, %v3313_v20 }
 0x165   : > { %v586_v45 = vand.u32 2147483647, %v585_v27  ;;  %v1026_v17 = vmul.u32 %v3280_v58, %v3372_v37  ;;  %v989_v3 = vmul.u32 %v985_v15, %v3313_v20  ;;  %vm1016_vm12 = vc.u32 %v1008_v60, %v1012_v56 }
 0x166   : > { %v1018_v57 = vadd.s32 %v1012_v56, %v1008_v60  ;;  %vm994_vm14 = vc.u32 %v986_v59, %v990_v9  ;;  %v996_v28 = vadd.s32 %v990_v9, %v986_v59  ;;  %v1017_v32 = vsel %vm1016_vm12, 1, %v2635_v5 }
 0x167   : > { %v589_v47 = vmul.f32 %v588_v34, %v586_v45  ;;  %v1412_v35 = vand.u32 31, %v1410_v2  ;;  %v995_v40 = vsel %vm994_vm14, 1, %v2635_v5  ;;  %v1019_v30 = vadd.s32 %v1017_v32, %v1011_v44 }
 0x168   : > { %vm1020_vm15 = vc.u32 %v1018_v57, %v1014_v39  ;;  %v997_v1 = vadd.s32 %v995_v40, %v989_v3  ;;  %vm998_vm2 = vc.u32 %v996_v28, %v992_v38  ;;  %v1013_v55 = vshrl.u32 %v1009_v31, 16 }
 0x169   : > { %v590_v62 = vxor.u32 2147483648, %v589_v47  ;;  %v1021_v58 = vsel %vm1020_vm15, 1, %v2635_v5  ;;  %v999_v22 = vsel %vm998_vm2, 1, %v2635_v5  ;;  %v3388_v42 = vsub.s32 32, %v1412_v35 }
 0x16a   : > { %v1023_v61 = vadd.s32 %v1021_v58, %v1019_v30  ;;  %v991_v13 = vshrl.u32 %v987_v7, 16  ;;  %v1001_v29 = vadd.s32 %v999_v22, %v997_v1  ;;  %v3393_v6 = vshrl.u32 %v1410_v2, 5 }
 0x16b   : > { %v591_v20 = vsel %vm470_vm0, %v590_v62, %v589_v47  ;;  %v993_v8 = vshrl.u32 %v988_v21, 16  ;;  %v1015_v14 = vshrl.u32 %v1010_v25, 16  ;;  %v3395_v26 = vadd.s32 %v1018_v57, %v1014_v39 }
 0x16c   : > { %v594_v36 = vsel %vm3296_vm1, %v3062_v43, %v591_v20  ;;  %v1024_v0 = vadd.s32 %v1023_v61, %v1013_v55  ;;  %v1002_v19 = vadd.s32 %v1001_v29, %v991_v13  ;;  %v1415_v24 = vshll.u32 %v2629_v46, %v1412_v35 }
 0x16d   : > { %v596_v11 = vmul.f32 %v594_v36, %v594_v36  ;;  %v1418_v41 = vshll.u32 %v2630_v48, %v1412_v35  ;;  %v1416_v18 = vshrl.u32 %v2630_v48, %v3388_v42  ;;  %v1419_v27 = vshrl.u32 %v2631_v50, %v3388_v42 }
 0x16e   : > { %v1025_v15 = vadd.s32 %v1024_v0, %v1015_v14  ;;  %v3401_v31 = vadd.s32 %v1002_v19, %v993_v8  ;;  %v1422_v25 = vshrl.u32 %v2632_v52, %v3388_v42  ;;  %v1424_v37 = vshll.u32 %v2632_v52, %v1412_v35 }
 0x16f   : > { %v597_v10 = vmul.f32 -0.001358992, %v596_v11  ;;  %v604_v53 = vmul.f32 -0.00019511016, %v596_v11  ;;  %v1425_v21 = vshrl.u32 %v2633_v54, %v3388_v42  ;;  %v1421_v2 = vshll.u32 %v2631_v50, %v1412_v35 }
 0x170   : > { %v1029_v7 = vadd.s32 1, %v1025_v15  ;;  %vm1028_vm0 = vc.u32 %v3401_v31, %v3395_v26  ;;  %v1427_v45 = vshll.u32 %v2633_v54, %v1412_v35  ;;  %v1428_v34 = vshrl.u32 %v2634_v63, %v3388_v42 }
 0x171   : > { %v598_v60 = vadd.f32 0.041655596, %v597_v10  ;;  %v605_v59 = vadd.f32 0.008332121, %v604_v53  ;;  %v1426_v38 = vor.u32 %v1425_v21, %v1424_v37  ;;  %v3416_v47 = vor.u32 %v1416_v18, %v1415_v24 }
 0x172   : > { %v1030_v9 = vsel %vm1028_vm0, %v1029_v7, %v1025_v15  ;;  %v3418_v3 = vor.u32 %v1419_v27, %v1418_v41  ;;  %v3420_v57 = vor.u32 %v1422_v25, %v1421_v2  ;;  %v1429_v62 = vor.u32 %v1428_v34, %v1427_v45 }
 0x173   : > { %v599_v56 = vmul.f32 %v598_v60, %v596_v11  ;;  %v606_v39 = vmul.f32 %v605_v59, %v596_v11  ;;  %v1031_v44 = vadd.s32 %v1030_v9, %v1026_v17  ;;  %v613_v40 = vand.u32 3, %v3368_v51 }
 0x174   : > { %v1406_v30 = vor.u32 8388608, %v3289_v49  ;;  %vm1433_vm1 = vcmp.lt.s32.totalorder %v3393_v6, 4  ;;  %vm1430_vm3 = vcmp.lt.s32.totalorder %v3393_v6, 1  ;;  %vm1432_vm4 = vcmp.lt.s32.totalorder %v3393_v6, 3 }
 0x175   : > { %v600_v28 = vadd.f32 -0.4999988, %v599_v56  ;;  %v607_v32 = vadd.f32 -0.16666654, %v606_v39  ;;  %v1032_v35 = vadd.s32 536870912, %v1031_v44  ;;  %v1438_v51 = vsel %vm1430_vm3, %v3416_v47, %v3418_v3 }
 0x176   : > { %v1439_v17 = vsel %vm1433_vm1, %v1426_v38, 920167782  ;;  %v1442_v49 = vsel %vm1430_vm3, %v3418_v3, %v3420_v57  ;;  %v1443_v13 = vsel %vm1433_vm1, %v1429_v62, 1326507024  ;;  %vm1431_vm5 = vcmp.lt.s32.totalorder %v3393_v6, 2 }
 0x177   : > { %v601_v1 = vmul.f32 %v600_v28, %v596_v11  ;;  %v608_v55 = vmul.f32 %v607_v32, %v596_v11  ;;  %v3428_v58 = vshrl.u32 %v1032_v35, 30  ;;  %v1440_v61 = vsel %vm1432_vm4, %v3420_v57, %v1439_v17 }
 0x178   : > { %v1444_v11 = vsel %vm1432_vm4, %v1426_v38, %v1443_v13  ;;  %v3448_v8 = vshll.u32 %v1406_v30, 8  ;;  %vm611_vm6 = vweird.f32 %v3062_v43  ;;  %vm614_vm7 = vcmp.lt.s32.totalorder %v613_v40, 2 }
 0x179   : > { %v602_v20 = vadd.f32 1.0, %v601_v1  ;;  %v609_v22 = vadd.f32 1.0, %v608_v55  ;;  %v1034_v29 = vshll.u32 %v3428_v58, 30  ;;  %v1445_v19 = vsel %vm1431_vm5, %v1442_v49, %v1444_v11 }
 0x17a   : > { %vm615_vm8 = vcmp.eq.s32.totalorder %v613_v40, 0  ;;  %v1441_v41 = vsel %vm1431_vm5, %v1438_v51, %v1440_v61  ;;  %vm618_vm9 = vcmp.eq.s32.totalorder %v613_v40, 2  ;;  %v1448_v53 = vshrl.u32 %v3448_v8, 16  ;;  %v307_v61 = vpop.f32.mrf.mxu3 }
 0x17b   : > { %v610_v14 = vmul.f32 %v609_v22, %v594_v36  ;;  %v619_v0 = vxor.u32 2147483648, %v602_v20  ;;  %v1035_v24 = vsub.s32 %v1031_v44, %v1034_v29  ;;  %v1449_v15 = vand.u32 65535, %v1445_v19 }
 0x17c   : > { %v1447_v18 = vand.u32 65535, %v3448_v8  ;;  %v1450_v27 = vshrl.u32 %v1445_v19, 16  ;;  %v1471_v59 = vand.u32 65535, %v1441_v41  ;;  %v1472_v45 = vshrl.u32 %v1441_v41, 16 }
 0x17d   : > { %v616_v10 = vxor.u32 2147483648, %v610_v14  ;;  %vm1036_vm11 = vcmp.lt.s32.totalorder %v1035_v24, 0  ;;  %v1037_v36 = vsub.s32 0, %v1035_v24  ;;  %v620_v37 = vsel %vm618_vm9, %v619_v0, %v610_v14 }
 0x17e   : > { %v1453_v60 = vmul.u32 %v1449_v15, %v1448_v53  ;;  %v1452_v2 = vmul.u32 %v1450_v27, %v1447_v18  ;;  %v1451_v39 = vmul.u32 %v1449_v15, %v1447_v18  ;;  %v1414_v44 = vshrl.u32 %v2629_v46, %v3388_v42 }
 0x17f   : > { %v617_v25 = vsel %vm615_vm8, %v602_v20, %v616_v10  ;;  %v1038_v21 = vsel %vm1036_vm11, %v1037_v36, %v1035_v24  ;;  %v1454_v28 = vmul.u32 %v1450_v27, %v1448_v53  ;;  %v1474_v40 = vmul.u32 %v1472_v45, %v1447_v18 }
 0x180   : > { %v621_v7 = vsel %vm614_vm7, %v617_v25, %v620_v37  ;;  %v1039_v56 = vclz %v1038_v21  ;;  %v1455_v9 = vshll.u32 %v1452_v2, 16  ;;  %v1457_v32 = vshll.u32 %v1453_v60, 16 }
 0x181   : > { %v622_v34 = vsel %vm611_vm6, nan, %v621_v7  ;;  %v1475_v35 = vmul.u32 %v1471_v59, %v1448_v53  ;;  %v1027_v30 = vadd.s32 %v3395_v26, %v3401_v31  ;;  %v1456_v43 = vshrl.u32 %v1452_v2, 16 }
 0x182   : > { %2329 = vst [vmem:[%s3055_s24 + $0x8] sm:$0xff] %v622_v34  ;;  %v2457_v38 = vadd.s32 4294967294, %v1039_v56  ;;  %vm1459_vm10 = vc.u32 %v1451_v39, %v1455_v9  ;;  %v1461_v62 = vadd.s32 %v1455_v9, %v1451_v39  ;;  %v1477_v51 = vshll.u32 %v1474_v40, 16 }
 0x183   : > { %v1460_v1 = vsel %vm1459_vm10, 1, %v2635_v5  ;;  %v1473_v22 = vmul.u32 %v1471_v59, %v1447_v18  ;;  %v1476_v11 = vmul.u32 %v1472_v45, %v1448_v53  ;;  %v1479_v14 = vshll.u32 %v1475_v35, 16 }
 0x184   : > { %vm2458_vm13 = vcmp.lt.s32.totalorder %v2457_v38, 0  ;;  %v1462_v17 = vadd.s32 %v1460_v1, %v1454_v28  ;;  %vm1463_vm12 = vc.u32 %v1461_v62, %v1457_v32  ;;  %v1435_v19 = vsel %vm1433_vm1, %v3420_v57, 2102212464 }
 0x185   : > { %v1042_v55 = vsel %vm2458_vm13, 0, %v2457_v38  ;;  %v1464_v42 = vsel %vm1463_vm12, 1, %v2635_v5  ;;  %vm1481_vm14 = vc.u32 %v1473_v22, %v1477_v51  ;;  %v1483_v31 = vadd.s32 %v1477_v51, %v1473_v22 }
 0x186   : > { %v1043_v49 = vsub.s32 32, %v1042_v55  ;;  %v1047_v20 = vsub.s32 4294967266, %v1042_v55  ;;  %v1044_v13 = vshll.u32 %v1035_v24, %v1042_v55  ;;  %v1466_v29 = vadd.s32 %v1464_v42, %v1462_v17 }
 0x187   : > { %v1482_v10 = vsel %vm1481_vm14, 1, %v2635_v5  ;;  %v3472_v15 = vadd.f32 %v3252_v4, %v307_v61  ;;  %vm1485_vm15 = vc.u32 %v1483_v31, %v1479_v14  ;;  %v1057_v53 = vsub.s32 4, %v3428_v58 }
 0x188   : > { %v1045_v0 = vshrl.u32 %v1027_v30, %v1043_v49  ;;  %v1048_v26 = vadd.s32 127, %v1047_v20  ;;  %v1467_v41 = vadd.s32 %v1466_v29, %v1456_v43  ;;  %v1484_v24 = vadd.s32 %v1482_v10, %v1476_v11 }
 0x189   : > { %v1458_v27 = vshrl.u32 %v1453_v60, 16  ;;  %v1486_v25 = vsel %vm1485_vm15, 1, %v2635_v5  ;;  %v2018_v37 = vand.u32 2147483647, %v3472_v15  ;;  %vm935_vm2 = vcmp.lt.s32.totalorder %v3255_v12, 0 }
 0x18a   : > { %v1046_v36 = vor.u32 %v1045_v0, %v1044_v13  ;;  %v1049_v18 = vshll.u32 %v1048_v26, 23  ;;  %v1478_v59 = vshrl.u32 %v1474_v40, 16  ;;  %v1488_v7 = vadd.s32 %v1486_v25, %v1484_v24 }
 0x18b   : > { %v1434_v21 = vsel %vm1430_vm3, %v1414_v44, %v3416_v47  ;;  %v1436_v2 = vsel %vm1432_vm4, %v3418_v3, %v1435_v19  ;;  %v1468_v45 = vadd.s32 %v1467_v41, %v1458_v27  ;;  %v2021_v60 = vand.u32 2139095040, %v3472_v15  ;;  %v280_v44 = vpop.f32.mrf.mxu0 }
 0x18c   : > { %v1050_v57 = vor.u32 4788187, %v1049_v18  ;;  %v1053_v56 = vcvt.s32.f32 %v1046_v36  ;;  %v1480_v39 = vshrl.u32 %v1475_v35, 16  ;;  %v1489_v9 = vadd.s32 %v1488_v7, %v1478_v59 }
 0x18d   : > { %v1058_v38 = vsel %vm935_vm2, %v1057_v53, %v3428_v58  ;;  %v1487_v28 = vadd.s32 %v1483_v31, %v1479_v14  ;;  %v2022_v32 = vshrl.u32 %v2021_v60, 23  ;;  %v2025_v47 = vand.u32 8388607, %v2018_v37 }
 0x18e   : > { %v1051_v34 = vand.u32 2147483647, %v1050_v57  ;;  %v1437_v3 = vsel %vm1431_vm5, %v1434_v21, %v1436_v2  ;;  %v1490_v40 = vadd.s32 %v1489_v9, %v1480_v39  ;;  %vm934_vm0 = vcmp.le.f32.partialorder %v933_v16, 0.7853982 }
 0x18f   : > { %vm1493_vm1 = vc.u32 %v1468_v45, %v1487_v28  ;;  %v2477_v35 = vadd.s32 4294967169, %v2022_v32  ;;  %v1060_v43 = vsel %vm934_vm0, 0, %v1058_v38  ;;  %v3495_v58 = vadd.f32 %v3252_v4, %v280_v44 }
 0x190   : > { %v1054_v62 = vmul.f32 %v1053_v56, %v1051_v34  ;;  %v1494_v1 = vadd.s32 1, %v1490_v40  ;;  %v1491_v55 = vmul.u32 %v3448_v8, %v1437_v3  ;;  %v2026_v17 = vor.u32 8388608, %v2025_v47 }
 0x191   : > { %v2028_v51 = vadd.s32 1, %v2477_v35  ;;  %v1077_v42 = vadd.s32 3, %v1060_v43  ;;  %v626_v13 = vand.u32 2139095040, %v3495_v58  ;;  %v623_v19 = vand.u32 2147483647, %v3495_v58 }
 0x192   : > { %v1055_v30 = vxor.u32 2147483648, %v1054_v62  ;;  %v1495_v49 = vsel %vm1493_vm1, %v1494_v1, %v1490_v40  ;;  %v3502_v11 = vshll.u32 %v2026_v17, 8  ;;  %v3507_v36 = vadd.s32 %v1487_v28, %v1468_v45 }
 0x193   : > { %v1496_v16 = vadd.s32 %v1495_v49, %v1491_v55  ;;  %vm2029_vm3 = vcmp.gt.s32.totalorder %v2028_v51, 0  ;;  %v3504_v0 = vand.u32 3, %v1077_v42  ;;  %v627_v18 = vshrl.u32 %v626_v13, 23 }
 0x194   : > { %v1056_v6 = vsel %vm935_vm2, %v1055_v30, %v1054_v62  ;;  %v2030_v61 = vsel %vm2029_vm3, %v2028_v51, 0  ;;  %vm1400_vm4 = vcmp.lt.s32.totalorder %v3266_v23, 0  ;;  %v3514_v25 = vand.u32 65535, %v3502_v11 }
 0x195   : > { %v1059_v20 = vsel %vm934_vm0, %v3255_v12, %v1056_v6  ;;  %v1497_v29 = vadd.s32 536870912, %v1496_v16  ;;  %v2032_v4 = vand.u32 31, %v2030_v61  ;;  %v3510_v53 = vshrl.u32 %v2030_v61, 5 }
 0x196   : > { %v1061_v22 = vmul.f32 %v1059_v20, %v1059_v20  ;;  %vm1083_vm5 = vcmp.eq.s32.totalorder %v3504_v0, 2  ;;  %vm1080_vm6 = vcmp.eq.s32.totalorder %v3504_v0, 0  ;;  %vm1079_vm8 = vcmp.lt.s32.totalorder %v3504_v0, 2 }
 0x197   : > { %v1498_v26 = vshrl.u32 %v1497_v29, 30  ;;  %v2033_v31 = vsub.s32 32, %v2032_v4  ;;  %v2035_v27 = vshll.u32 %v2629_v46, %v2032_v4  ;;  %v2038_v21 = vshll.u32 %v2630_v48, %v2032_v4 }
 0x198   : > { %v1062_v8 = vmul.f32 -0.001358992, %v1061_v22  ;;  %v1069_v14 = vmul.f32 -0.00019511016, %v1061_v22  ;;  %v2041_v60 = vshll.u32 %v2631_v50, %v2032_v4  ;;  %v2044_v38 = vshll.u32 %v2632_v52, %v2032_v4 }
 0x199   : > { %v1499_v24 = vshll.u32 %v1498_v26, 30  ;;  %v2036_v7 = vshrl.u32 %v2630_v48, %v2033_v31  ;;  %v2039_v45 = vshrl.u32 %v2631_v50, %v2033_v31  ;;  %v2042_v34 = vshrl.u32 %v2632_v52, %v2033_v31 }
 0x19a   : > { %v1063_v41 = vadd.f32 0.041655596, %v1062_v8  ;;  %v1070_v10 = vadd.f32 0.008332121, %v1069_v14  ;;  %v1522_v9 = vsub.s32 4, %v1498_v26  ;;  %v2034_v32 = vshrl.u32 %v2629_v46, %v2033_v31 }
 0x19b   : > { %v3518_v2 = vsub.s32 %v1496_v16, %v1499_v24  ;;  %v2045_v47 = vshrl.u32 %v2633_v54, %v2033_v31  ;;  %v2037_v3 = vor.u32 %v2036_v7, %v2035_v27  ;;  %v2047_v40 = vshll.u32 %v2633_v54, %v2032_v4 }
 0x19c   : > { %v1064_v57 = vmul.f32 %v1063_v41, %v1061_v22  ;;  %v1071_v59 = vmul.f32 %v1070_v10, %v1061_v22  ;;  %vm1076_vm9 = vweird.f32 %v3255_v12  ;;  %v2040_v30 = vor.u32 %v2039_v45, %v2038_v21 }
 0x19d   : > { %vm1501_vm7 = vcmp.lt.s32.totalorder %v3518_v2, 0  ;;  %v1502_v28 = vsub.s32 0, %v3518_v2  ;;  %v2043_v43 = vor.u32 %v2042_v34, %v2041_v60  ;;  %v2048_v1 = vshrl.u32 %v2634_v63, %v2033_v31 }
 0x19e   : > { %v1065_v56 = vadd.f32 -0.4999988, %v1064_v57  ;;  %v1072_v39 = vadd.f32 -0.16666654, %v1071_v59  ;;  %vm2050_vm11 = vcmp.lt.s32.totalorder %v3510_v53, 1  ;;  %v2046_v6 = vor.u32 %v2045_v47, %v2044_v38 }
 0x19f   : > { %v1503_v35 = vsel %vm1501_vm7, %v1502_v28, %v3518_v2  ;;  %v2049_v49 = vor.u32 %v2048_v1, %v2047_v40  ;;  %v2068_v42 = vshrl.u32 %v3502_v11, 16  ;;  %v2450_v16 = vadd.s32 4294967169, %v627_v18 }
 0x1a0   : > { %v1066_v44 = vmul.f32 %v1065_v56, %v1061_v22  ;;  %v1073_v62 = vmul.f32 %v1072_v39, %v1061_v22  ;;  %v1504_v51 = vclz %v1503_v35  ;;  %v3539_v29 = vsel %vm1400_vm4, %v1522_v9, %v1498_v26 }
 0x1a1   : > { %vm3543_vm10 = vcmp.le.f32.partialorder %v1398_v33, 0.7853982  ;;  %vm2051_vm13 = vcmp.lt.s32.totalorder %v3510_v53, 2  ;;  %vm2052_vm12 = vcmp.lt.s32.totalorder %v3510_v53, 3  ;;  %vm2053_vm14 = vcmp.lt.s32.totalorder %v3510_v53, 4 }
 0x1a2   : > { %v1067_v55 = vadd.f32 1.0, %v1066_v44  ;;  %v1074_v17 = vadd.f32 1.0, %v1073_v62  ;;  %v2466_v13 = vadd.s32 4294967294, %v1504_v51  ;;  %v2058_v14 = vsel %vm2050_vm11, %v2037_v3, %v2040_v30 }
 0x1a3   : > { %v2062_v33 = vsel %vm2050_vm11, %v2040_v30, %v2043_v43  ;;  %v2059_v41 = vsel %vm2053_vm14, %v2046_v6, 920167782  ;;  %v2063_v10 = vsel %vm2053_vm14, %v2049_v49, 1326507024  ;;  %v2055_v57 = vsel %vm2053_vm14, %v2043_v43, 2102212464 }
 0x1a4   : > { %v1075_v22 = vmul.f32 %v1074_v17, %v1059_v20  ;;  %v1084_v61 = vxor.u32 2147483648, %v1067_v55  ;;  %v2054_v20 = vsel %vm2050_vm11, %v2034_v32, %v2037_v3  ;;  %vm2467_vm15 = vcmp.lt.s32.totalorder %v2466_v13, 0 }
 0x1a5   : > { %v1507_v31 = vsel %vm2467_vm15, 0, %v2466_v13  ;;  %v2060_v21 = vsel %vm2052_vm12, %v2043_v43, %v2059_v41  ;;  %v2064_v45 = vsel %vm2052_vm12, %v2046_v6, %v2063_v10  ;;  %v2056_v0 = vsel %vm2052_vm12, %v2040_v30, %v2055_v57 }
 0x1a6   : > { %v1081_v8 = vxor.u32 2147483648, %v1075_v22  ;;  %v1085_v26 = vsel %vm1083_vm5, %v1084_v61, %v1075_v22  ;;  %v1508_v24 = vsub.s32 32, %v1507_v31  ;;  %v1512_v27 = vsub.s32 4294967266, %v1507_v31 }
 0x1a7   : > { %v1509_v7 = vshll.u32 %v3518_v2, %v1507_v31  ;;  %v2061_v39 = vsel %vm2051_vm13, %v2058_v14, %v2060_v21  ;;  %v2065_v2 = vsel %vm2051_vm13, %v2062_v33, %v2064_v45  ;;  %v3580_v62 = vand.u32 8388607, %v623_v19 }
 0x1a8   : > { %v1082_v18 = vsel %vm1080_vm6, %v1067_v55, %v1081_v8  ;;  %v1510_v34 = vshrl.u32 %v3507_v36, %v1508_v24  ;;  %v1513_v56 = vadd.s32 127, %v1512_v27  ;;  %v2091_v9 = vand.u32 65535, %v2061_v39 }
 0x1a9   : > { %v1086_v59 = vsel %vm1079_vm8, %v1082_v18, %v1085_v26  ;;  %v2092_v38 = vshrl.u32 %v2061_v39, 16  ;;  %v2069_v47 = vand.u32 65535, %v2065_v2  ;;  %v2070_v12 = vshrl.u32 %v2065_v2, 16 }
 0x1aa   : > { %v1087_v60 = vsel %vm1076_vm9, nan, %v1086_v59  ;;  %v1511_v28 = vor.u32 %v1510_v34, %v1509_v7  ;;  %v1514_v32 = vshll.u32 %v1513_v56, 23  ;;  %v2095_v36 = vmul.u32 %v2091_v9, %v2068_v42 }
 0x1ab   : > { %2332 = vst [vmem:[%s3055_s24 + $0x20] sm:$0xff] %v1087_v60  ;;  %v2094_v44 = vmul.u32 %v2092_v38, %v3514_v25  ;;  %v633_v3 = vadd.s32 1, %v2450_v16  ;;  %v1525_v35 = vsel %vm3543_vm10, 0, %v3539_v29  ;;  %v3587_v30 = vsel %vm2051_vm13, %v2054_v20, %v2056_v0 }
 0x1ac   : > { %v1515_v40 = vor.u32 4788187, %v1514_v32  ;;  %v2072_v43 = vmul.u32 %v2070_v12, %v3514_v25  ;;  %v2073_v1 = vmul.u32 %v2069_v47, %v2068_v42  ;;  %v2093_v55 = vmul.u32 %v2091_v9, %v3514_v25 }
 0x1ad   : > { %v2096_v17 = vmul.u32 %v2092_v38, %v2068_v42  ;;  %v2097_v51 = vshll.u32 %v2094_v44, 16  ;;  %v1518_v49 = vcvt.s32.f32 %v1511_v28  ;;  %v2071_v16 = vmul.u32 %v2069_v47, %v3514_v25 }
 0x1ae   : > { %v1516_v6 = vand.u32 2147483647, %v1515_v40  ;;  %v2075_v22 = vshll.u32 %v2072_v43, 16  ;;  %v2074_v61 = vmul.u32 %v2070_v12, %v2068_v42  ;;  %v2077_v13 = vshll.u32 %v2073_v1, 16 }
 0x1af   : > { %v2099_v8 = vshll.u32 %v2095_v36, 16  ;;  %vm2101_vm2 = vc.u32 %v2093_v55, %v2097_v51  ;;  %v2103_v33 = vadd.s32 %v2097_v51, %v2093_v55  ;;  %vm634_vm1 = vcmp.gt.s32.totalorder %v633_v3, 0 }
 0x1b0   : > { %v1519_v29 = vmul.f32 %v1518_v49, %v1516_v6  ;;  %vm2079_vm0 = vc.u32 %v2071_v16, %v2075_v22  ;;  %v2081_v53 = vadd.s32 %v2075_v22, %v2071_v16  ;;  %v2102_v20 = vsel %vm2101_vm2, 1, %v2635_v5 }
 0x1b1   : > { %v2080_v14 = vsel %vm2079_vm0, 1, %v2635_v5  ;;  %v2104_v26 = vadd.s32 %v2102_v20, %v2096_v17  ;;  %v635_v10 = vsel %vm634_vm1, %v633_v3, 0  ;;  %v1542_v25 = vadd.s32 3, %v1525_v35 }
 0x1b2   : > { %v1520_v31 = vxor.u32 2147483648, %v1519_v29  ;;  %v2082_v41 = vadd.s32 %v2080_v14, %v2074_v61  ;;  %vm2083_vm3 = vc.u32 %v2081_v53, %v2077_v13  ;;  %v2076_v18 = vshrl.u32 %v2072_v43, 16 }
 0x1b3   : > { %v2084_v42 = vsel %vm2083_vm3, 1, %v2635_v5  ;;  %vm2105_vm5 = vc.u32 %v2103_v33, %v2099_v8  ;;  %v637_v59 = vand.u32 31, %v635_v10  ;;  %v2098_v21 = vshrl.u32 %v2094_v44, 16 }
 0x1b4   : > { %v1521_v24 = vsel %vm1400_vm4, %v1520_v31, %v1519_v29  ;;  %v2086_v27 = vadd.s32 %v2084_v42, %v2082_v41  ;;  %v2106_v57 = vsel %vm2105_vm5, 1, %v2635_v5  ;;  %v2111_v60 = vmul.u32 %v3502_v11, %v3587_v30 }
 0x1b5   : > { %v1524_v7 = vsel %vm3543_vm10, %v3266_v23, %v1521_v24  ;;  %v2108_v45 = vadd.s32 %v2106_v57, %v2104_v26  ;;  %v2078_v56 = vshrl.u32 %v2073_v1, 16  ;;  %v3603_v0 = vsub.s32 32, %v637_v59 }
 0x1b6   : > { %v1526_v34 = vmul.f32 %v1524_v7, %v1524_v7  ;;  %v2087_v39 = vadd.s32 %v2086_v27, %v2076_v18  ;;  %v2100_v2 = vshrl.u32 %v2095_v36, 16  ;;  %v3605_v9 = vadd.s32 %v2103_v33, %v2099_v8 }
 0x1b7   : > { %v2109_v38 = vadd.s32 %v2108_v45, %v2098_v21  ;;  %v643_v28 = vshll.u32 %v2630_v48, %v637_v59  ;;  %v3610_v12 = vshrl.u32 %v635_v10, 5  ;;  %v644_v11 = vshrl.u32 %v2631_v50, %v3603_v0 }
 0x1b8   : > { %v1527_v32 = vmul.f32 -0.001358992, %v1526_v34  ;;  %v1534_v47 = vmul.f32 -0.00019511016, %v1526_v34  ;;  %v3608_v4 = vadd.s32 %v2087_v39, %v2078_v56  ;;  %v646_v3 = vshll.u32 %v2631_v50, %v637_v59 }
 0x1b9   : > { %v2110_v44 = vadd.s32 %v2109_v38, %v2100_v2  ;;  %v647_v36 = vshrl.u32 %v2632_v52, %v3603_v0  ;;  %v649_v30 = vshll.u32 %v2632_v52, %v637_v59  ;;  %v640_v1 = vshll.u32 %v2629_v46, %v637_v59 }
 0x1ba   : > { %v1528_v40 = vadd.f32 0.041655596, %v1527_v32  ;;  %v1535_v35 = vadd.f32 0.008332121, %v1534_v47  ;;  %vm2113_vm4 = vc.u32 %v3608_v4, %v3605_v9  ;;  %v641_v55 = vshrl.u32 %v2630_v48, %v3603_v0 }
 0x1bb   : > { %v2114_v43 = vadd.s32 1, %v2110_v44  ;;  %v3623_v17 = vor.u32 %v644_v11, %v643_v28  ;;  %v650_v49 = vshrl.u32 %v2633_v54, %v3603_v0  ;;  %v652_v16 = vshll.u32 %v2633_v54, %v637_v59 }
 0x1bc   : > { %v1529_v51 = vmul.f32 %v1528_v40, %v1526_v34  ;;  %v1536_v6 = vmul.f32 %v1535_v35, %v1526_v34  ;;  %v3628_v61 = vor.u32 %v647_v36, %v646_v3  ;;  %v653_v13 = vshrl.u32 %v2634_v63, %v3603_v0 }
 0x1bd   : > { %v2115_v22 = vsel %vm2113_vm4, %v2114_v43, %v2110_v44  ;;  %vm658_vm6 = vcmp.lt.s32.totalorder %v3610_v12, 4  ;;  %v651_v20 = vor.u32 %v650_v49, %v649_v30  ;;  %v631_v14 = vor.u32 8388608, %v3580_v62 }
 0x1be   : > { %v1530_v8 = vadd.f32 -0.4999988, %v1529_v51  ;;  %v1537_v29 = vadd.f32 -0.16666654, %v1536_v6  ;;  %v2116_v53 = vadd.s32 %v2115_v22, %v2111_v60  ;;  %v642_v33 = vor.u32 %v641_v55, %v640_v1 }
 0x1bf   : > { %v654_v26 = vor.u32 %v653_v13, %v652_v16  ;;  %vm655_vm7 = vcmp.lt.s32.totalorder %v3610_v12, 1  ;;  %vm657_vm8 = vcmp.lt.s32.totalorder %v3610_v12, 3  ;;  %v1543_v18 = vand.u32 3, %v1542_v25 }
 0x1c0   : > { %v1531_v31 = vmul.f32 %v1530_v8, %v1526_v34  ;;  %v1538_v41 = vmul.f32 %v1537_v29, %v1526_v34  ;;  %v2117_v10 = vadd.s32 536870912, %v2116_v53  ;;  %vm656_vm9 = vcmp.lt.s32.totalorder %v3610_v12, 2 }
 0x1c1   : > { %v664_v42 = vsel %vm658_vm6, %v651_v20, 920167782  ;;  %v668_v24 = vsel %vm658_vm6, %v654_v26, 1326507024  ;;  %v667_v59 = vsel %vm655_vm7, %v3623_v17, %v3628_v61  ;;  %vm1541_vm11 = vweird.f32 %v3266_v23 }
 0x1c2   : > { %v1532_v27 = vadd.f32 1.0, %v1531_v31  ;;  %v1539_v62 = vadd.f32 1.0, %v1538_v41  ;;  %v3641_v57 = vshrl.u32 %v2117_v10, 30  ;;  %v663_v25 = vsel %vm655_vm7, %v642_v33, %v3623_v17 }
 0x1c3   : > { %v669_v21 = vsel %vm657_vm8, %v651_v20, %v668_v24  ;;  %v3653_v45 = vshll.u32 %v631_v14, 8  ;;  %v665_v39 = vsel %vm657_vm8, %v3628_v61, %v664_v42  ;;  %vm1544_vm10 = vcmp.lt.s32.totalorder %v1543_v18, 2 }
 0x1c4   : > { %v1540_v60 = vmul.f32 %v1539_v62, %v1524_v7  ;;  %v1549_v34 = vxor.u32 2147483648, %v1532_v27  ;;  %v2119_v56 = vshll.u32 %v3641_v57, 30  ;;  %v670_v2 = vsel %vm656_vm9, %v667_v59, %v669_v21 }
 0x1c5   : > { %v672_v38 = vand.u32 65535, %v3653_v45  ;;  %v673_v28 = vshrl.u32 %v3653_v45, 16  ;;  %vm1545_vm13 = vcmp.eq.s32.totalorder %v1543_v18, 0  ;;  %vm1548_vm12 = vcmp.eq.s32.totalorder %v1543_v18, 2 }
 0x1c6   : > { %v1546_v32 = vxor.u32 2147483648, %v1540_v60  ;;  %v2120_v47 = vsub.s32 %v2116_v53, %v2119_v56  ;;  %v639_v7 = vshrl.u32 %v2629_v46, %v3603_v0  ;;  %v666_v44 = vsel %vm656_vm9, %v663_v25, %v665_v39  ;;  %v289_v25 = vpop.f32.mrf.mxu1 }
 0x1c7   : > { %v674_v11 = vand.u32 65535, %v670_v2  ;;  %v675_v3 = vshrl.u32 %v670_v2, 16  ;;  %v1550_v40 = vsel %vm1548_vm12, %v1549_v34, %v1540_v60  ;;  %v696_v0 = vand.u32 65535, %v666_v44 }
 0x1c8   : > { %v1547_v36 = vsel %vm1545_vm13, %v1532_v27, %v1546_v32  ;;  %vm2121_vm14 = vcmp.lt.s32.totalorder %v2120_v47, 0  ;;  %v2122_v35 = vsub.s32 0, %v2120_v47  ;;  %v697_v49 = vshrl.u32 %v666_v44, 16 }
 0x1c9   : > { %v1551_v30 = vsel %vm1544_vm10, %v1547_v36, %v1550_v40  ;;  %v676_v43 = vmul.u32 %v674_v11, %v672_v38  ;;  %v677_v1 = vmul.u32 %v675_v3, %v672_v38  ;;  %v678_v55 = vmul.u32 %v674_v11, %v673_v28 }
 0x1ca   : > { %v1552_v51 = vsel %vm1541_vm11, nan, %v1551_v30  ;;  %v2123_v6 = vsel %vm2121_vm14, %v2122_v35, %v2120_v47  ;;  %v2112_v8 = vadd.s32 %v3605_v9, %v3608_v4  ;;  %v659_v29 = vsel %vm655_vm7, %v639_v7, %v642_v33 }
 0x1cb   : > { %2335 = vst [vmem:[%s3055_s24 + $0x38] sm:$0xff] %v1552_v51  ;;  %v2124_v16 = vclz %v2123_v6  ;;  %v680_v22 = vshll.u32 %v677_v1, 16  ;;  %v682_v13 = vshll.u32 %v678_v55, 16  ;;  %v679_v20 = vmul.u32 %v675_v3, %v673_v28 }
 0x1cc   : > { %vm2020_vm2 = vcmp.lt.s32.totalorder %v3472_v15, 0  ;;  %v698_v26 = vmul.u32 %v696_v0, %v672_v38  ;;  %v699_v31 = vmul.u32 %v697_v49, %v672_v38  ;;  %v700_v41 = vmul.u32 %v696_v0, %v673_v28 }
 0x1cd   : > { %v2478_v53 = vadd.s32 4294967294, %v2124_v16  ;;  %vm684_vm15 = vc.u32 %v676_v43, %v680_v22  ;;  %v686_v14 = vadd.s32 %v680_v22, %v676_v43  ;;  %v2142_v10 = vsub.s32 4, %v3641_v57  ;;  %v298_v22 = vpop.f32.mrf.mxu2 }
 0x1ce   : > { %v685_v23 = vsel %vm684_vm15, 1, %v2635_v5  ;;  %v681_v4 = vshrl.u32 %v677_v1, 16  ;;  %v702_v42 = vshll.u32 %v699_v31, 16  ;;  %v701_v59 = vmul.u32 %v697_v49, %v673_v28  ;;  %v3686_v28 = vld [vmem:[%s4238_s2] ss:$0 sm:$0xff] }
 0x1cf   : > { %vm2479_vm0 = vcmp.lt.s32.totalorder %v2478_v53, 0  ;;  %v687_v18 = vadd.s32 %v685_v23, %v679_v20  ;;  %vm688_vm1 = vc.u32 %v686_v14, %v682_v13  ;;  %v704_v60 = vshll.u32 %v700_v41, 16 }
 0x1d0   : > { %v2127_v9 = vsel %vm2479_vm0, 0, %v2478_v53  ;;  %v689_v33 = vsel %vm688_vm1, 1, %v2635_v5  ;;  %vm706_vm3 = vc.u32 %v698_v26, %v702_v42  ;;  %v708_v34 = vadd.s32 %v702_v42, %v698_v26 }
 0x1d1   : > { %v2128_v24 = vsub.s32 32, %v2127_v9  ;;  %v2132_v27 = vsub.s32 4294967266, %v2127_v9  ;;  %v691_v62 = vadd.s32 %v689_v33, %v687_v18  ;;  %v2129_v21 = vshll.u32 %v2120_v47, %v2127_v9 }
 0x1d2   : > { %v707_v38 = vsel %vm706_vm3, 1, %v2635_v5  ;;  %v660_v32 = vsel %vm658_vm6, %v3628_v61, 2102212464  ;;  %vm710_vm5 = vc.u32 %v708_v34, %v704_v60  ;;  %v3689_v47 = vadd.f32 %v3686_v28, %v289_v25 }
 0x1d3   : > { %v2130_v56 = vshrl.u32 %v2112_v8, %v2128_v24  ;;  %v2133_v39 = vadd.s32 127, %v2132_v27  ;;  %v692_v2 = vadd.s32 %v691_v62, %v681_v4  ;;  %v709_v7 = vadd.s32 %v707_v38, %v701_v59 }
 0x1d4   : > { %v683_v3 = vshrl.u32 %v678_v55, 16  ;;  %v711_v36 = vsel %vm710_vm5, 1, %v2635_v5  ;;  %v703_v40 = vshrl.u32 %v699_v31, 16  ;;  %v1088_v30 = vand.u32 2147483647, %v3689_v47 }
 0x1d5   : > { %v2131_v44 = vor.u32 %v2130_v56, %v2129_v21  ;;  %v2134_v11 = vshll.u32 %v2133_v39, 23  ;;  %v713_v35 = vadd.s32 %v711_v36, %v709_v7  ;;  %v1091_v61 = vand.u32 2139095040, %v3689_v47 }
 0x1d6   : > { %v2143_v1 = vsel %vm2020_vm2, %v2142_v10, %v3641_v57  ;;  %v661_v51 = vsel %vm657_vm8, %v3623_v17, %v660_v32  ;;  %v693_v6 = vadd.s32 %v692_v2, %v683_v3  ;;  %v705_v0 = vshrl.u32 %v700_v41, 16 }
 0x1d7   : > { %v2135_v43 = vor.u32 4788187, %v2134_v11  ;;  %v714_v55 = vadd.s32 %v713_v35, %v703_v40  ;;  %v1092_v49 = vshrl.u32 %v1091_v61, 23  ;;  %v1095_v16 = vand.u32 8388607, %v1088_v30 }
 0x1d8   : > { %v2138_v8 = vcvt.s32.f32 %v2131_v44  ;;  %v712_v53 = vadd.s32 %v708_v34, %v704_v60  ;;  %vm3704_vm4 = vcmp.le.f32.partialorder %v2018_v37, 0.7853982  ;;  %v662_v17 = vsel %vm656_vm9, %v659_v29, %v661_v51 }
 0x1d9   : > { %v2136_v13 = vand.u32 2147483647, %v2135_v43  ;;  %v715_v57 = vadd.s32 %v714_v55, %v705_v0  ;;  %v2459_v14 = vadd.s32 4294967169, %v1092_v49  ;;  %v2145_v26 = vsel %vm3704_vm4, 0, %v2143_v1 }
 0x1da   : > { %vm718_vm6 = vc.u32 %v693_v6, %v712_v53  ;;  %v3713_v31 = vadd.f32 %v3686_v28, %v298_v22  ;;  %v1096_v10 = vor.u32 8388608, %v1095_v16  ;;  %v716_v9 = vmul.u32 %v3653_v45, %v662_v17 }
 0x1db   : > { %v2139_v23 = vmul.f32 %v2138_v8, %v2136_v13  ;;  %v719_v41 = vadd.s32 1, %v715_v57  ;;  %v1098_v18 = vadd.s32 1, %v2459_v14  ;;  %v2162_v4 = vadd.s32 3, %v2145_v26 }
 0x1dc   : > { %v1556_v24 = vand.u32 2139095040, %v3713_v31  ;;  %v3724_v59 = vshll.u32 %v1096_v10, 8  ;;  %v1553_v45 = vand.u32 2147483647, %v3713_v31  ;;  %v3731_v34 = vadd.s32 %v712_v53, %v693_v6 }
 0x1dd   : > { %v2140_v37 = vxor.u32 2147483648, %v2139_v23  ;;  %v720_v33 = vsel %vm718_vm6, %v719_v41, %v715_v57  ;;  %vm1099_vm7 = vcmp.gt.s32.totalorder %v1098_v18, 0  ;;  %v3729_v60 = vand.u32 3, %v2162_v4 }
 0x1de   : > { %v721_v29 = vadd.s32 %v720_v33, %v716_v9  ;;  %v1100_v42 = vsel %vm1099_vm7, %v1098_v18, 0  ;;  %v1557_v32 = vshrl.u32 %v1556_v24, 23  ;;  %v3738_v11 = vand.u32 65535, %v3724_v59 }
 0x1df   : > { %v2141_v12 = vsel %vm2020_vm2, %v2140_v37, %v2139_v23  ;;  %v1102_v62 = vand.u32 31, %v1100_v42  ;;  %v3742_v3 = vand.u32 8388607, %v1553_v45  ;;  %v3746_v61 = vshrl.u32 %v3724_v59, 16 }
 0x1e0   : > { %v3722_v27 = vsel %vm3704_vm4, %v3472_v15, %v2141_v12  ;;  %v722_v21 = vadd.s32 536870912, %v721_v29  ;;  %v3754_v16 = vshrl.u32 %v1100_v42, 5  ;;  %vm2168_vm8 = vcmp.eq.s32.totalorder %v3729_v60, 2 }
 0x1e1   : > { %v2146_v25 = vmul.f32 %v3722_v27, %v3722_v27  ;;  %v1103_v56 = vsub.s32 32, %v1102_v62  ;;  %v1105_v7 = vshll.u32 %v2629_v46, %v1102_v62  ;;  %v1108_v43 = vshll.u32 %v2630_v48, %v1102_v62 }
 0x1e2   : > { %v3733_v38 = vshrl.u32 %v722_v21, 30  ;;  %v1114_v51 = vshll.u32 %v2632_v52, %v1102_v62  ;;  %v1111_v13 = vshll.u32 %v2631_v50, %v1102_v62  ;;  %v2468_v53 = vadd.s32 4294967169, %v1557_v32 }
 0x1e3   : > { %v2147_v39 = vmul.f32 -0.001358992, %v2146_v25  ;;  %v2154_v2 = vmul.f32 -0.00019511016, %v2146_v25  ;;  %v1106_v44 = vshrl.u32 %v2630_v48, %v1103_v56  ;;  %v1109_v1 = vshrl.u32 %v2631_v50, %v1103_v56 }
 0x1e4   : > { %v724_v35 = vshll.u32 %v3733_v38, 30  ;;  %v1115_v6 = vshrl.u32 %v2633_v54, %v1103_v56  ;;  %v1112_v8 = vshrl.u32 %v2632_v52, %v1103_v56  ;;  %vm2165_vm11 = vcmp.eq.s32.totalorder %v3729_v60, 0 }
 0x1e5   : > { %v2148_v36 = vadd.f32 0.041655596, %v2147_v39  ;;  %v2155_v40 = vadd.f32 0.008332121, %v2154_v2  ;;  %v3757_v22 = vor.u32 %v1106_v44, %v1105_v7  ;;  %v3764_v14 = vor.u32 %v1109_v1, %v1108_v43 }
 0x1e6   : > { %v3752_v49 = vsub.s32 %v721_v29, %v724_v35  ;;  %v1116_v23 = vor.u32 %v1115_v6, %v1114_v51  ;;  %v1117_v26 = vshll.u32 %v2633_v54, %v1102_v62  ;;  %v1118_v41 = vshrl.u32 %v2634_v63, %v1103_v56 }
 0x1e7   : > { %v2149_v0 = vmul.f32 %v2148_v36, %v2146_v25  ;;  %v2156_v55 = vmul.f32 %v2155_v40, %v2146_v25  ;;  %vm2164_vm10 = vcmp.lt.s32.totalorder %v3729_v60, 2  ;;  %vm1120_vm13 = vcmp.lt.s32.totalorder %v3754_v16, 1 }
 0x1e8   : > { %vm726_vm9 = vcmp.lt.s32.totalorder %v3752_v49, 0  ;;  %v727_v57 = vsub.s32 0, %v3752_v49  ;;  %vm2161_vm12 = vweird.f32 %v3472_v15  ;;  %vm625_vm14 = vcmp.lt.s32.totalorder %v3495_v58, 0 }
 0x1e9   : > { %v2150_v20 = vadd.f32 -0.4999988, %v2149_v0  ;;  %v2157_v17 = vadd.f32 -0.16666654, %v2156_v55  ;;  %v1113_v4 = vor.u32 %v1112_v8, %v1111_v13  ;;  %vm1123_vm15 = vcmp.lt.s32.totalorder %v3754_v16, 4 }
 0x1ea   : > { %v728_v37 = vsel %vm726_vm9, %v727_v57, %v3752_v49  ;;  %v1561_v33 = vor.u32 8388608, %v3742_v3  ;;  %vm1122_vm2 = vcmp.lt.s32.totalorder %v3754_v16, 3  ;;  %v3776_v42 = vadd.s32 1, %v2468_v53 }
 0x1eb   : > { %v2151_v10 = vmul.f32 %v2150_v20, %v2146_v25  ;;  %v2158_v18 = vmul.f32 %v2157_v17, %v2146_v25  ;;  %v729_v9 = vclz %v728_v37  ;;  %v1119_v62 = vor.u32 %v1118_v41, %v1117_v26 }
 0x1ec   : > { %vm1121_vm0 = vcmp.lt.s32.totalorder %v3754_v16, 2  ;;  %v1128_v25 = vsel %vm1120_vm13, %v3757_v22, %v3764_v14  ;;  %vm3786_vm1 = vcmp.le.f32.partialorder %v623_v19, 0.7853982  ;;  %v1104_v32 = vshrl.u32 %v2629_v46, %v1103_v56 }
 0x1ed   : > { %v2152_v12 = vadd.f32 1.0, %v2151_v10  ;;  %v2159_v29 = vadd.f32 1.0, %v2158_v18  ;;  %v2451_v24 = vadd.s32 4294967294, %v729_v9  ;;  %v1129_v7 = vsel %vm1123_vm15, %v1116_v23, 920167782 }
 0x1ee   : > { %v747_v44 = vsub.s32 4, %v3733_v38  ;;  %v1130_v36 = vsel %vm1122_vm2, %v1113_v4, %v1129_v7  ;;  %v1133_v6 = vsel %vm1123_vm15, %v1119_v62, 1326507024  ;;  %v3865_v16 = vshll.u32 %v1561_v33, 8 }
 0x1ef   : > { %v2160_v21 = vmul.f32 %v2159_v29, %v3722_v27  ;;  %v2169_v39 = vxor.u32 2147483648, %v2152_v12  ;;  %vm2452_vm3 = vcmp.lt.s32.totalorder %v2451_v24, 0  ;;  %v1132_v27 = vsel %vm1120_vm13, %v3764_v14, %v1113_v4 }
 0x1f0   : > { %v732_v35 = vsel %vm2452_vm3, 0, %v2451_v24  ;;  %v1131_v56 = vsel %vm1121_vm0, %v1128_v25, %v1130_v36  ;;  %v1134_v55 = vsel %vm1122_vm2, %v1116_v23, %v1133_v6  ;;  %v748_v26 = vsel %vm625_vm14, %v747_v44, %v3733_v38 }
 0x1f1   : > { %v2166_v40 = vxor.u32 2147483648, %v2160_v21  ;;  %v2170_v19 = vsel %vm2168_vm8, %v2169_v39, %v2160_v21  ;;  %v733_v43 = vsub.s32 32, %v732_v35  ;;  %v734_v1 = vshll.u32 %v3752_v49, %v732_v35 }
 0x1f2   : > { %v737_v51 = vsub.s32 4294967266, %v732_v35  ;;  %v1161_v13 = vand.u32 65535, %v1131_v56  ;;  %v1162_v8 = vshrl.u32 %v1131_v56, 16  ;;  %v1135_v49 = vsel %vm1121_vm0, %v1132_v27, %v1134_v55 }
 0x1f3   : > { %v2167_v0 = vsel %vm2165_vm11, %v2152_v12, %v2166_v40  ;;  %v735_v20 = vshrl.u32 %v3731_v34, %v733_v43  ;;  %v1139_v41 = vand.u32 65535, %v1135_v49  ;;  %v1140_v23 = vshrl.u32 %v1135_v49, 16 }
 0x1f4   : > { %v2171_v53 = vsel %vm2164_vm10, %v2167_v0, %v2170_v19  ;;  %v738_v17 = vadd.s32 127, %v737_v51  ;;  %v1164_v60 = vmul.u32 %v1162_v8, %v3738_v11  ;;  %v1165_v34 = vmul.u32 %v1161_v13, %v3746_v61 }
 0x1f5   : > { %v2172_v57 = vsel %vm2161_vm12, nan, %v2171_v53  ;;  %v736_v10 = vor.u32 %v735_v20, %v734_v1  ;;  %v1141_v37 = vmul.u32 %v1139_v41, %v3738_v11  ;;  %v1142_v9 = vmul.u32 %v1140_v23, %v3738_v11 }
 0x1f6   : > { %2339 = vst [vmem:[%s3055_s24 + $0x58] sm:$0xff] %v2172_v57  ;;  %v739_v18 = vshll.u32 %v738_v17, 23  ;;  %v1143_v15 = vmul.u32 %v1139_v41, %v3746_v61  ;;  %v1163_v12 = vmul.u32 %v1161_v13, %v3738_v11  ;;  %v750_v38 = vsel %vm3786_vm1, 0, %v748_v26 }
 0x1f7   : > { %v1124_v24 = vsel %vm1120_vm13, %v1104_v32, %v3757_v22  ;;  %v1167_v62 = vshll.u32 %v1164_v60, 16  ;;  %v1125_v25 = vsel %vm1123_vm15, %v1113_v4, 2102212464  ;;  %v1144_v21 = vmul.u32 %v1140_v23, %v3746_v61 }
 0x1f8   : > { %v740_v29 = vor.u32 4788187, %v739_v18  ;;  %v1145_v39 = vshll.u32 %v1142_v9, 16  ;;  %v1147_v7 = vshll.u32 %v1143_v15, 16  ;;  %v743_v36 = vcvt.s32.f32 %v736_v10 }
 0x1f9   : > { %v1166_v11 = vmul.u32 %v1162_v8, %v3746_v61  ;;  %v1169_v27 = vshll.u32 %v1165_v34, 16  ;;  %vm1171_vm4 = vc.u32 %v1163_v12, %v1167_v62  ;;  %v1173_v19 = vadd.s32 %v1167_v62, %v1163_v12 }
 0x1fa   : > { %v741_v44 = vand.u32 2147483647, %v740_v29  ;;  %vm1149_vm5 = vc.u32 %v1141_v37, %v1145_v39  ;;  %v1151_v40 = vadd.s32 %v1145_v39, %v1141_v37  ;;  %v1126_v22 = vsel %vm1122_vm2, %v3764_v14, %v1125_v25 }
 0x1fb   : > { %v1150_v4 = vsel %vm1149_vm5, 1, %v2635_v5  ;;  %v1172_v32 = vsel %vm1171_vm4, 1, %v2635_v5  ;;  %vm1175_vm7 = vc.u32 %v1173_v19, %v1169_v27  ;;  %v1146_v61 = vshrl.u32 %v1142_v9, 16 }
 0x1fc   : > { %v744_v35 = vmul.f32 %v743_v36, %v741_v44  ;;  %v1152_v56 = vadd.s32 %v1150_v4, %v1144_v21  ;;  %vm1153_vm6 = vc.u32 %v1151_v40, %v1147_v7  ;;  %v1174_v43 = vadd.s32 %v1172_v32, %v1166_v11 }
 0x1fd   : > { %v1154_v51 = vsel %vm1153_vm6, 1, %v2635_v5  ;;  %v1176_v6 = vsel %vm1175_vm7, 1, %v2635_v5  ;;  %v1168_v55 = vshrl.u32 %v1164_v60, 16  ;;  %vm1564_vm8 = vcmp.gt.s32.totalorder %v3776_v42, 0 }
 0x1fe   : > { %v745_v1 = vxor.u32 2147483648, %v744_v35  ;;  %v1156_v0 = vadd.s32 %v1154_v51, %v1152_v56  ;;  %v1178_v13 = vadd.s32 %v1176_v6, %v1174_v43  ;;  %v767_v8 = vadd.s32 3, %v750_v38 }
 0x1ff   : > { %v1148_v53 = vshrl.u32 %v1143_v15, 16  ;;  %v1565_v20 = vsel %vm1564_vm8, %v3776_v42, 0  ;;  %v1170_v57 = vshrl.u32 %v1165_v34, 16  ;;  %v1127_v23 = vsel %vm1121_vm0, %v1124_v24, %v1126_v22 }
 0x200   : > { %v746_v14 = vsel %vm625_vm14, %v745_v1, %v744_v35  ;;  %v1157_v49 = vadd.s32 %v1156_v0, %v1146_v61  ;;  %v1179_v26 = vadd.s32 %v1178_v13, %v1168_v55  ;;  %v1567_v10 = vand.u32 31, %v1565_v20 }
 0x201   : > { %v749_v17 = vsel %vm3786_vm1, %v3495_v58, %v746_v14  ;;  %v3854_v60 = vadd.s32 %v1173_v19, %v1169_v27  ;;  %v3856_v42 = vand.u32 3, %v767_v8  ;;  %v1181_v2 = vmul.u32 %v3724_v59, %v1127_v23 }
 0x202   : > { %v751_v41 = vmul.f32 %v749_v17, %v749_v17  ;;  %v3852_v18 = vadd.s32 %v1157_v49, %v1148_v53  ;;  %v1180_v37 = vadd.s32 %v1179_v26, %v1170_v57  ;;  %v3858_v12 = vsub.s32 32, %v1567_v10 }
 0x203   : > { %v3867_v24 = vshrl.u32 %v1565_v20, 5  ;;  %v1570_v21 = vshll.u32 %v2629_v46, %v1567_v10  ;;  %v1573_v44 = vshll.u32 %v2630_v48, %v1567_v10  ;;  %v1576_v11 = vshll.u32 %v2631_v50, %v1567_v10 }
 0x204   : > { %v752_v9 = vmul.f32 -0.001358992, %v751_v41  ;;  %v759_v15 = vmul.f32 -0.00019511016, %v751_v41  ;;  %vm1183_vm9 = vc.u32 %v3852_v18, %v3854_v60  ;;  %v1184_v34 = vadd.s32 1, %v1180_v37 }
 0x205   : > { %v1571_v62 = vshrl.u32 %v2630_v48, %v3858_v12  ;;  %v1574_v59 = vshrl.u32 %v2631_v50, %v3858_v12  ;;  %v1577_v39 = vshrl.u32 %v2632_v52, %v3858_v12  ;;  %v1579_v27 = vshll.u32 %v2632_v52, %v1567_v10 }
 0x206   : > { %v753_v29 = vadd.f32 0.041655596, %v752_v9  ;;  %v760_v38 = vadd.f32 0.008332121, %v759_v15  ;;  %v1185_v25 = vsel %vm1183_vm9, %v1184_v34, %v1180_v37  ;;  %v1580_v40 = vshrl.u32 %v2633_v54, %v3858_v12 }
 0x207   : > { %v1186_v33 = vadd.s32 %v1185_v25, %v1181_v2  ;;  %v3877_v36 = vor.u32 %v1571_v62, %v1570_v21  ;;  %v3883_v4 = vor.u32 %v1574_v59, %v1573_v44  ;;  %v1578_v32 = vor.u32 %v1577_v39, %v1576_v11  ;;  %v310_v39 = vpop.f32.mrf.mxu3 }
 0x208   : > { %v754_v7 = vmul.f32 %v753_v29, %v751_v41  ;;  %v761_v3 = vmul.f32 %v760_v38, %v751_v41  ;;  %v1581_v56 = vor.u32 %v1580_v40, %v1579_v27  ;;  %v1582_v43 = vshll.u32 %v2633_v54, %v1567_v10 }
 0x209   : > { %v1187_v22 = vadd.s32 536870912, %v1186_v33  ;;  %v1583_v1 = vshrl.u32 %v2634_v63, %v3858_v12  ;;  %vm1588_vm11 = vcmp.lt.s32.totalorder %v3867_v24, 4  ;;  %vm1585_vm10 = vcmp.lt.s32.totalorder %v3867_v24, 1 }
 0x20a   : > { %v755_v19 = vadd.f32 -0.4999988, %v754_v7  ;;  %v762_v35 = vadd.f32 -0.16666654, %v761_v3  ;;  %vm1587_vm13 = vcmp.lt.s32.totalorder %v3867_v24, 3  ;;  %v1593_v53 = vsel %vm1585_vm10, %v3877_v36, %v3883_v4 }
 0x20b   : > { %v3888_v6 = vshrl.u32 %v1187_v22, 30  ;;  %v1584_v0 = vor.u32 %v1583_v1, %v1582_v43  ;;  %v1594_v55 = vsel %vm1588_vm11, %v1581_v56, 920167782  ;;  %vm769_vm12 = vcmp.lt.s32.totalorder %v3856_v42, 2 }
 0x20c   : > { %v756_v61 = vmul.f32 %v755_v19, %v751_v41  ;;  %v763_v51 = vmul.f32 %v762_v35, %v751_v41  ;;  %vm1586_vm14 = vcmp.lt.s32.totalorder %v3867_v24, 2  ;;  %v1595_v20 = vsel %vm1587_vm13, %v1578_v32, %v1594_v55 }
 0x20d   : > { %v1189_v8 = vshll.u32 %v3888_v6, 30  ;;  %v1598_v49 = vsel %vm1588_vm11, %v1584_v0, 1326507024  ;;  %v1597_v23 = vsel %vm1585_vm10, %v3883_v4, %v1578_v32  ;;  %vm770_vm15 = vcmp.eq.s32.totalorder %v3856_v42, 0 }
 0x20e   : > { %v757_v13 = vadd.f32 1.0, %v756_v61  ;;  %v764_v14 = vadd.f32 1.0, %v763_v51  ;;  %vm773_vm2 = vcmp.eq.s32.totalorder %v3856_v42, 2  ;;  %v1596_v10 = vsel %vm1586_vm14, %v1593_v53, %v1595_v20 }
 0x20f   : > { %v1190_v41 = vsub.s32 %v1186_v33, %v1189_v8  ;;  %v1599_v37 = vsel %vm1587_vm13, %v1581_v56, %v1598_v49  ;;  %v1603_v29 = vshrl.u32 %v3865_v16, 16  ;;  %v1626_v38 = vand.u32 65535, %v1596_v10 }
 0x210   : > { %v765_v57 = vmul.f32 %v764_v14, %v749_v17  ;;  %v774_v26 = vxor.u32 2147483648, %v757_v13  ;;  %v1602_v17 = vand.u32 65535, %v3865_v16  ;;  %v1600_v34 = vsel %vm1586_vm14, %v1597_v23, %v1599_v37 }
 0x211   : > { %vm1191_vm0 = vcmp.lt.s32.totalorder %v1190_v41, 0  ;;  %v1192_v15 = vsub.s32 0, %v1190_v41  ;;  %v1604_v21 = vand.u32 65535, %v1600_v34  ;;  %v1605_v59 = vshrl.u32 %v1600_v34, 16 }
 0x212   : > { %v771_v9 = vxor.u32 2147483648, %v765_v57  ;;  %v775_v2 = vsel %vm773_vm2, %v774_v26, %v765_v57  ;;  %vm766_vm1 = vweird.f32 %v3495_v58  ;;  %v1627_v33 = vshrl.u32 %v1596_v10, 16 }
 0x213   : > { %v1193_v25 = vsel %vm1191_vm0, %v1192_v15, %v1190_v41  ;;  %v1607_v11 = vmul.u32 %v1605_v59, %v1602_v17  ;;  %v1608_v27 = vmul.u32 %v1604_v21, %v1603_v29  ;;  %v1182_v40 = vadd.s32 %v3854_v60, %v3852_v18 }
 0x214   : > { %v772_v62 = vsel %vm770_vm15, %v757_v13, %v771_v9  ;;  %v1194_v3 = vclz %v1193_v25  ;;  %v1569_v35 = vshrl.u32 %v2629_v46, %v3858_v12  ;;  %v3928_v22 = vadd.f32 %v3686_v28, %v310_v39 }
 0x215   : > { %v776_v7 = vsel %vm769_vm12, %v772_v62, %v775_v2  ;;  %v1590_v58 = vsel %vm1588_vm11, %v1578_v32, 2102212464  ;;  %v1606_v42 = vmul.u32 %v1604_v21, %v1602_v17  ;;  %v1610_v56 = vshll.u32 %v1607_v11, 16 }
 0x216   : > { %v777_v44 = vsel %vm766_vm1, nan, %v776_v7  ;;  %v2460_v19 = vadd.s32 4294967294, %v1194_v3  ;;  %v1628_v43 = vmul.u32 %v1626_v38, %v1602_v17  ;;  %v1609_v1 = vmul.u32 %v1605_v59, %v1603_v29 }
 0x217   : > { %2330 = vst [vmem:[%s3055_s24 + $0x10] sm:$0xff] %v777_v44  ;;  %v1612_v61 = vshll.u32 %v1608_v27, 16  ;;  %v1629_v51 = vmul.u32 %v1627_v33, %v1602_v17  ;;  %vm1090_vm5 = vcmp.lt.s32.totalorder %v3689_v47, 0  ;;  %vm1614_vm4 = vc.u32 %v1606_v42, %v1610_v56 }
 0x218   : > { %vm2461_vm3 = vcmp.lt.s32.totalorder %v2460_v19, 0  ;;  %v1616_v60 = vadd.s32 %v1610_v56, %v1606_v42  ;;  %v1630_v0 = vmul.u32 %v1626_v38, %v1603_v29  ;;  %v1611_v13 = vshrl.u32 %v1607_v11, 16 }
 0x219   : > { %v1197_v18 = vsel %vm2461_vm3, 0, %v2460_v19  ;;  %v1615_v14 = vsel %vm1614_vm4, 1, %v2635_v5  ;;  %v1631_v32 = vmul.u32 %v1627_v33, %v1603_v29  ;;  %v1632_v53 = vshll.u32 %v1629_v51, 16 }
 0x21a   : > { %v1198_v12 = vsub.s32 32, %v1197_v18  ;;  %v1202_v55 = vsub.s32 4294967266, %v1197_v18  ;;  %v1617_v8 = vadd.s32 %v1615_v14, %v1609_v1  ;;  %vm1618_vm6 = vc.u32 %v1616_v60, %v1612_v61 }
 0x21b   : > { %v1199_v20 = vshll.u32 %v1190_v41, %v1197_v18  ;;  %v1619_v26 = vsel %vm1618_vm6, 1, %v2635_v5  ;;  %v1634_v10 = vshll.u32 %v1630_v0, 16  ;;  %vm1636_vm7 = vc.u32 %v1628_v43, %v1632_v53 }
 0x21c   : > { %v1200_v49 = vshrl.u32 %v1182_v40, %v1198_v12  ;;  %v1203_v57 = vadd.s32 127, %v1202_v55  ;;  %v1621_v23 = vadd.s32 %v1619_v26, %v1617_v8  ;;  %v1638_v37 = vadd.s32 %v1632_v53, %v1628_v43  ;;  %v301_v12 = vpop.f32.mrf.mxu2 }
 0x21d   : > { %v1212_v17 = vsub.s32 4, %v3888_v6  ;;  %v1637_v2 = vsel %vm1636_vm7, 1, %v2635_v5  ;;  %v1589_v34 = vsel %vm1585_vm10, %v1569_v35, %v3877_v36  ;;  %v1613_v62 = vshrl.u32 %v1608_v27, 16 }
 0x21e   : > { %v1201_v9 = vor.u32 %v1200_v49, %v1199_v20  ;;  %v1204_v15 = vshll.u32 %v1203_v57, 23  ;;  %v1622_v29 = vadd.s32 %v1621_v23, %v1611_v13  ;;  %v1639_v41 = vadd.s32 %v1637_v2, %v1631_v32 }
 0x21f   : > { %vm1640_vm8 = vc.u32 %v1638_v37, %v1634_v10  ;;  %v2173_v21 = vand.u32 2147483647, %v3928_v22  ;;  %v1591_v59 = vsel %vm1587_vm13, %v3883_v4, %v1590_v58  ;;  %v1633_v39 = vshrl.u32 %v1629_v51, 16 }
 0x220   : > { %v1205_v38 = vor.u32 4788187, %v1204_v15  ;;  %v1641_v25 = vsel %vm1640_vm8, 1, %v2635_v5  ;;  %v2176_v3 = vand.u32 2139095040, %v3928_v22  ;;  %v1208_v44 = vcvt.s32.f32 %v1201_v9 }
 0x221   : > { %v1643_v7 = vadd.s32 %v1641_v25, %v1639_v41  ;;  %v1213_v36 = vsel %vm1090_vm5, %v1212_v17, %v3888_v6  ;;  %v1623_v11 = vadd.s32 %v1622_v29, %v1613_v62  ;;  %v1635_v27 = vshrl.u32 %v1630_v0, 16 }
 0x222   : > { %v1206_v33 = vand.u32 2147483647, %v1205_v38  ;;  %v2177_v19 = vshrl.u32 %v2176_v3, 23  ;;  %v2180_v35 = vand.u32 8388607, %v2173_v21  ;;  %v1642_v56 = vadd.s32 %v1638_v37, %v1634_v10 }
 0x223   : > { %v1644_v40 = vadd.s32 %v1643_v7, %v1633_v39  ;;  %vm1089_vm9 = vcmp.le.f32.partialorder %v1088_v30, 0.7853982  ;;  %v1592_v4 = vsel %vm1586_vm14, %v1589_v34, %v1591_v59  ;;  %v3962_v20 = vadd.f32 %v3686_v28, %v301_v12 }
 0x224   : > { %v1209_v42 = vmul.f32 %v1208_v44, %v1206_v33  ;;  %v2480_v43 = vadd.s32 4294967169, %v2177_v19  ;;  %v1215_v61 = vsel %vm1089_vm9, 0, %v1213_v36  ;;  %vm1648_vm11 = vc.u32 %v1623_v11, %v1642_v56 }
 0x225   : > { %v1645_v58 = vadd.s32 %v1644_v40, %v1635_v27  ;;  %v2181_v51 = vor.u32 8388608, %v2180_v35  ;;  %v1646_v0 = vmul.u32 %v3865_v16, %v1592_v4  ;;  %v1232_v30 = vadd.s32 3, %v1215_v61 }
 0x226   : > { %v1210_v1 = vxor.u32 2147483648, %v1209_v42  ;;  %v2183_v18 = vadd.s32 1, %v2480_v43  ;;  %v3966_v9 = vadd.s32 %v1642_v56, %v1623_v11  ;;  %v1708_v34 = vand.u32 2147483647, %v3962_v20 }
 0x227   : > { %v1649_v6 = vadd.s32 1, %v1645_v58  ;;  %v3959_v53 = vshll.u32 %v2181_v51, 8  ;;  %v3964_v23 = vand.u32 3, %v1232_v30  ;;  %v1711_v28 = vand.u32 2139095040, %v3962_v20 }
 0x228   : > { %v1211_v60 = vsel %vm1090_vm5, %v1210_v1, %v1209_v42  ;;  %vm2184_vm10 = vcmp.gt.s32.totalorder %v2183_v18, 0  ;;  %vm1555_vm13 = vcmp.lt.s32.totalorder %v3713_v31, 0  ;;  %vm1231_vm0 = vweird.f32 %v3689_v47 }
 0x229   : > { %v1214_v55 = vsel %vm1089_vm9, %v3689_v47, %v1211_v60  ;;  %v1650_v13 = vsel %vm1648_vm11, %v1649_v6, %v1645_v58  ;;  %v2185_v8 = vsel %vm2184_vm10, %v2183_v18, 0  ;;  %v3970_v2 = vand.u32 65535, %v3959_v53 }
 0x22a   : > { %v1216_v24 = vmul.f32 %v1214_v55, %v1214_v55  ;;  %v1651_v14 = vadd.s32 %v1650_v13, %v1646_v0  ;;  %v2187_v32 = vand.u32 31, %v2185_v8  ;;  %vm1238_vm12 = vcmp.eq.s32.totalorder %v3964_v23, 2 }
 0x22b   : > { %v3983_v36 = vshrl.u32 %v2185_v8, 5  ;;  %vm1235_vm14 = vcmp.eq.s32.totalorder %v3964_v23, 0  ;;  %vm1234_vm15 = vcmp.lt.s32.totalorder %v3964_v23, 2  ;;  %v2223_v0 = vshrl.u32 %v3959_v53, 16 }
 0x22c   : > { %v1217_v49 = vmul.f32 -0.001358992, %v1216_v24  ;;  %v1224_v57 = vmul.f32 -0.00019511016, %v1216_v24  ;;  %v1652_v26 = vadd.s32 536870912, %v1651_v14  ;;  %v2188_v16 = vsub.s32 32, %v2187_v32 }
 0x22d   : > { %v2190_v17 = vshll.u32 %v2629_v46, %v2187_v32  ;;  %v2193_v62 = vshll.u32 %v2630_v48, %v2187_v32  ;;  %v2199_v39 = vshll.u32 %v2632_v52, %v2187_v32  ;;  %v2196_v11 = vshll.u32 %v2631_v50, %v2187_v32 }
 0x22e   : > { %v1218_v10 = vadd.f32 0.041655596, %v1217_v49  ;;  %v1225_v37 = vadd.f32 0.008332121, %v1224_v57  ;;  %v1653_v15 = vshrl.u32 %v1652_v26, 30  ;;  %v2191_v25 = vshrl.u32 %v2630_v48, %v2188_v16 }
 0x22f   : > { %v2194_v59 = vshrl.u32 %v2631_v50, %v2188_v16  ;;  %v2200_v7 = vshrl.u32 %v2633_v54, %v2188_v16  ;;  %v2197_v27 = vshrl.u32 %v2632_v52, %v2188_v16  ;;  %v2202_v40 = vshll.u32 %v2633_v54, %v2187_v32 }
 0x230   : > { %v1219_v29 = vmul.f32 %v1218_v10, %v1216_v24  ;;  %v1226_v41 = vmul.f32 %v1225_v37, %v1216_v24  ;;  %v1654_v38 = vshll.u32 %v1653_v15, 30  ;;  %v2203_v19 = vshrl.u32 %v2634_v63, %v2188_v16 }
 0x231   : > { %v1677_v4 = vsub.s32 4, %v1653_v15  ;;  %v2192_v58 = vor.u32 %v2191_v25, %v2190_v17  ;;  %v2195_v43 = vor.u32 %v2194_v59, %v2193_v62  ;;  %v2201_v1 = vor.u32 %v2200_v7, %v2199_v39 }
 0x232   : > { %v1220_v3 = vadd.f32 -0.4999988, %v1219_v29  ;;  %v1227_v33 = vadd.f32 -0.16666654, %v1226_v41  ;;  %v3981_v44 = vsub.s32 %v1651_v14, %v1654_v38  ;;  %vm2205_vm1 = vcmp.lt.s32.totalorder %v3983_v36, 1 }
 0x233   : > { %v2198_v60 = vor.u32 %v2197_v27, %v2196_v11  ;;  %vm2208_vm3 = vcmp.lt.s32.totalorder %v3983_v36, 4  ;;  %vm4000_vm5 = vcmp.le.f32.partialorder %v1553_v45, 0.7853982  ;;  %vm2207_vm4 = vcmp.lt.s32.totalorder %v3983_v36, 3 }
 0x234   : > { %v1221_v35 = vmul.f32 %v1220_v3, %v1216_v24  ;;  %v1228_v42 = vmul.f32 %v1227_v33, %v1216_v24  ;;  %vm1656_vm2 = vcmp.lt.s32.totalorder %v3981_v44, 0  ;;  %v1657_v56 = vsub.s32 0, %v3981_v44 }
 0x235   : > { %v2204_v24 = vor.u32 %v2203_v19, %v2202_v40  ;;  %vm2206_vm6 = vcmp.lt.s32.totalorder %v3983_v36, 2  ;;  %v2213_v8 = vsel %vm2205_vm1, %v2192_v58, %v2195_v43  ;;  %v1712_v32 = vshrl.u32 %v1711_v28, 23 }
 0x236   : > { %v1222_v61 = vadd.f32 1.0, %v1221_v35  ;;  %v1229_v6 = vadd.f32 1.0, %v1228_v42  ;;  %v1658_v51 = vsel %vm1656_vm2, %v1657_v56, %v3981_v44  ;;  %v2189_v45 = vshrl.u32 %v2629_v46, %v2188_v16 }
 0x237   : > { %v1659_v18 = vclz %v1658_v51  ;;  %v2214_v57 = vsel %vm2208_vm3, %v2201_v1, 920167782  ;;  %v2217_v37 = vsel %vm2205_vm1, %v2195_v43, %v2198_v60  ;;  %v2218_v28 = vsel %vm2208_vm3, %v2204_v24, 1326507024 }
 0x238   : > { %v1230_v12 = vmul.f32 %v1229_v6, %v1214_v55  ;;  %v1239_v30 = vxor.u32 2147483648, %v1222_v61  ;;  %v4010_v55 = vsel %vm1555_vm13, %v1677_v4, %v1653_v15  ;;  %v2215_v10 = vsel %vm2207_vm4, %v2198_v60, %v2214_v57 }
 0x239   : > { %v2469_v14 = vadd.s32 4294967294, %v1659_v18  ;;  %v2216_v16 = vsel %vm2206_vm6, %v2213_v8, %v2215_v10  ;;  %v2210_v62 = vsel %vm2208_vm3, %v2198_v60, 2102212464  ;;  %v2219_v59 = vsel %vm2207_vm4, %v2201_v1, %v2218_v28 }
 0x23a   : > { %v1236_v49 = vxor.u32 2147483648, %v1230_v12  ;;  %v1240_v26 = vsel %vm1238_vm12, %v1239_v30, %v1230_v12  ;;  %v2246_v39 = vand.u32 65535, %v2216_v16  ;;  %v2247_v7 = vshrl.u32 %v2216_v16, 16 }
 0x23b   : > { %vm2470_vm7 = vcmp.lt.s32.totalorder %v2469_v14, 0  ;;  %v2220_v11 = vsel %vm2206_vm6, %v2217_v37, %v2219_v59  ;;  %v2471_v47 = vadd.s32 4294967169, %v1712_v32  ;;  %v1680_v56 = vsel %vm4000_vm5, 0, %v4010_v55 }
 0x23c   : > { %v1237_v15 = vsel %vm1235_vm14, %v1222_v61, %v1236_v49  ;;  %v1662_v17 = vsel %vm2470_vm7, 0, %v2469_v14  ;;  %v2224_v27 = vand.u32 65535, %v2220_v11  ;;  %v2225_v40 = vshrl.u32 %v2220_v11, 16 }
 0x23d   : > { %v1241_v29 = vsel %vm1234_vm15, %v1237_v15, %v1240_v26  ;;  %v1663_v41 = vsub.s32 32, %v1662_v17  ;;  %v1667_v38 = vsub.s32 4294967266, %v1662_v17  ;;  %v1664_v3 = vshll.u32 %v3981_v44, %v1662_v17 }
 0x23e   : > { %v1242_v25 = vsel %vm1231_vm0, nan, %v1241_v29  ;;  %v2249_v19 = vmul.u32 %v2247_v7, %v3970_v2  ;;  %v2250_v4 = vmul.u32 %v2246_v39, %v2223_v0  ;;  %v2209_v44 = vsel %vm2205_vm1, %v2189_v45, %v2192_v58 }
 0x23f   : > { %2333 = vst [vmem:[%s3055_s24 + $0x28] sm:$0xff] %v1242_v25  ;;  %v1665_v33 = vshrl.u32 %v3966_v9, %v1663_v41  ;;  %v1668_v23 = vadd.s32 127, %v1667_v38  ;;  %v2211_v9 = vsel %vm2207_vm4, %v2195_v43, %v2210_v62  ;;  %v2227_v1 = vmul.u32 %v2225_v40, %v3970_v2 }
 0x240   : > { %v2228_v61 = vmul.u32 %v2224_v27, %v2223_v0  ;;  %v2248_v51 = vmul.u32 %v2246_v39, %v3970_v2  ;;  %v2251_v18 = vmul.u32 %v2247_v7, %v2223_v0  ;;  %v2252_v60 = vshll.u32 %v2249_v19, 16 }
 0x241   : > { %v1666_v35 = vor.u32 %v1665_v33, %v1664_v3  ;;  %v1669_v42 = vshll.u32 %v1668_v23, 23  ;;  %v2226_v30 = vmul.u32 %v2224_v27, %v3970_v2  ;;  %v2229_v24 = vmul.u32 %v2225_v40, %v2223_v0 }
 0x242   : > { %v2230_v14 = vshll.u32 %v2227_v1, 16  ;;  %v2232_v32 = vshll.u32 %v2228_v61, 16  ;;  %v2254_v49 = vshll.u32 %v2250_v4, 16  ;;  %vm2256_vm8 = vc.u32 %v2248_v51, %v2252_v60 }
 0x243   : > { %v1670_v6 = vor.u32 4788187, %v1669_v42  ;;  %v1673_v12 = vcvt.s32.f32 %v1666_v35  ;;  %v2257_v43 = vsel %vm2256_vm8, 1, %v2635_v5  ;;  %v2258_v55 = vadd.s32 %v2252_v60, %v2248_v51 }
 0x244   : > { %vm2234_vm9 = vc.u32 %v2226_v30, %v2230_v14  ;;  %v2236_v58 = vadd.s32 %v2230_v14, %v2226_v30  ;;  %v2259_v26 = vadd.s32 %v2257_v43, %v2251_v18  ;;  %v1718_v10 = vadd.s32 1, %v2471_v47 }
 0x245   : > { %v1671_v8 = vand.u32 2147483647, %v1670_v6  ;;  %v2235_v57 = vsel %vm2234_vm9, 1, %v2635_v5  ;;  %v2253_v15 = vshrl.u32 %v2249_v19, 16  ;;  %vm2260_vm10 = vc.u32 %v2258_v55, %v2254_v49 }
 0x246   : > { %v2237_v37 = vadd.s32 %v2235_v57, %v2229_v24  ;;  %vm2238_vm11 = vc.u32 %v2236_v58, %v2232_v32  ;;  %v2261_v17 = vsel %vm2260_vm10, 1, %v2635_v5  ;;  %vm1719_vm12 = vcmp.gt.s32.totalorder %v1718_v10, 0 }
 0x247   : > { %v1674_v45 = vmul.f32 %v1673_v12, %v1671_v8  ;;  %v2239_v0 = vsel %vm2238_vm11, 1, %v2635_v5  ;;  %v2231_v16 = vshrl.u32 %v2227_v1, 16  ;;  %v2263_v29 = vadd.s32 %v2261_v17, %v2259_v26 }
 0x248   : > { %v2241_v28 = vadd.s32 %v2239_v0, %v2237_v37  ;;  %v1720_v41 = vsel %vm1719_vm12, %v1718_v10, 0  ;;  %v2212_v62 = vsel %vm2206_vm6, %v2209_v44, %v2211_v9  ;;  %v2233_v25 = vshrl.u32 %v2228_v61, 16 }
 0x249   : > { %v1675_v2 = vxor.u32 2147483648, %v1674_v45  ;;  %v1722_v59 = vand.u32 31, %v1720_v41  ;;  %v2255_v3 = vshrl.u32 %v2250_v4, 16  ;;  %v2264_v33 = vadd.s32 %v2263_v29, %v2253_v15 }
 0x24a   : > { %v2242_v7 = vadd.s32 %v2241_v28, %v2231_v16  ;;  %v1715_v11 = vand.u32 8388607, %v1708_v34  ;;  %v1697_v40 = vadd.s32 3, %v1680_v56  ;;  %v4068_v36 = vadd.s32 %v2258_v55, %v2254_v49 }
 0x24b   : > { %v1676_v38 = vsel %vm1555_vm13, %v1675_v2, %v1674_v45  ;;  %v4064_v27 = vsub.s32 32, %v1722_v59  ;;  %v2265_v47 = vadd.s32 %v2264_v33, %v2255_v3  ;;  %v2266_v13 = vmul.u32 %v3959_v53, %v2212_v62 }
 0x24c   : > { %v1679_v39 = vsel %vm4000_vm5, %v3713_v31, %v1676_v38  ;;  %v4066_v19 = vadd.s32 %v2242_v7, %v2233_v25  ;;  %v4071_v44 = vshrl.u32 %v1720_v41, 5  ;;  %v1725_v9 = vshll.u32 %v2629_v46, %v1722_v59 }
 0x24d   : > { %v1681_v23 = vmul.f32 %v1679_v39, %v1679_v39  ;;  %v2269_v4 = vadd.s32 1, %v2265_v47  ;;  %v1729_v56 = vshrl.u32 %v2631_v50, %v4064_v27  ;;  %v1728_v6 = vshll.u32 %v2630_v48, %v1722_v59 }
 0x24e   : > { %vm2268_vm13 = vc.u32 %v4066_v19, %v4068_v36  ;;  %v1732_v51 = vshrl.u32 %v2632_v52, %v4064_v27  ;;  %v1726_v53 = vshrl.u32 %v2630_v48, %v4064_v27  ;;  %v1734_v60 = vshll.u32 %v2632_v52, %v1722_v59 }
 0x24f   : > { %v1682_v35 = vmul.f32 -0.001358992, %v1681_v23  ;;  %v1689_v42 = vmul.f32 -0.00019511016, %v1681_v23  ;;  %v2270_v18 = vsel %vm2268_vm13, %v2269_v4, %v2265_v47  ;;  %v1735_v12 = vshrl.u32 %v2633_v54, %v4064_v27 }
 0x250   : > { %v2271_v14 = vadd.s32 %v2270_v18, %v2266_v13  ;;  %v1731_v8 = vshll.u32 %v2631_v50, %v1722_v59  ;;  %v4087_v32 = vor.u32 %v1729_v56, %v1728_v6  ;;  %v1737_v58 = vshll.u32 %v2633_v54, %v1722_v59 }
 0x251   : > { %v1683_v1 = vadd.f32 0.041655596, %v1682_v35  ;;  %v1690_v61 = vadd.f32 0.008332121, %v1689_v42  ;;  %v1736_v49 = vor.u32 %v1735_v12, %v1734_v60  ;;  %v1738_v43 = vshrl.u32 %v2634_v63, %v4064_v27 }
 0x252   : > { %v2272_v45 = vadd.s32 536870912, %v2271_v14  ;;  %v4092_v52 = vor.u32 %v1732_v51, %v1731_v8  ;;  %v1698_v57 = vand.u32 3, %v1697_v40  ;;  %v1716_v26 = vor.u32 8388608, %v1715_v11 }
 0x253   : > { %v1684_v30 = vmul.f32 %v1683_v1, %v1681_v23  ;;  %v1691_v24 = vmul.f32 %v1690_v61, %v1681_v23  ;;  %v4094_v10 = vor.u32 %v1726_v53, %v1725_v9  ;;  %v1739_v37 = vor.u32 %v1738_v43, %v1737_v58 }
 0x254   : > { %v4096_v2 = vshrl.u32 %v2272_v45, 30  ;;  %vm1743_vm14 = vcmp.lt.s32.totalorder %v4071_v44, 4  ;;  %vm1740_vm15 = vcmp.lt.s32.totalorder %v4071_v44, 1  ;;  %vm1742_vm2 = vcmp.lt.s32.totalorder %v4071_v44, 3 }
 0x255   : > { %v1685_v55 = vadd.f32 -0.4999988, %v1684_v30  ;;  %v1692_v48 = vadd.f32 -0.16666654, %v1691_v24  ;;  %v1749_v54 = vsel %vm1743_vm14, %v1736_v49, 920167782  ;;  %v1752_v28 = vsel %vm1740_vm15, %v4087_v32, %v4092_v52 }
 0x256   : > { %v1753_v63 = vsel %vm1743_vm14, %v1739_v37, 1326507024  ;;  %v2274_v16 = vshll.u32 %v4096_v2, 30  ;;  %v1748_v29 = vsel %vm1740_vm15, %v4094_v10, %v4087_v32  ;;  %v1750_v41 = vsel %vm1742_vm2, %v4092_v52, %v1749_v54 }
 0x257   : > { %v1686_v15 = vmul.f32 %v1685_v55, %v1681_v23  ;;  %v1693_v50 = vmul.f32 %v1692_v48, %v1681_v23  ;;  %v1754_v38 = vsel %vm1742_vm2, %v1736_v49, %v1753_v63  ;;  %v4119_v62 = vshll.u32 %v1716_v26, 8 }
 0x258   : > { %v2275_v7 = vsub.s32 %v2271_v14, %v2274_v16  ;;  %vm1741_vm0 = vcmp.lt.s32.totalorder %v4071_v44, 2  ;;  %vm1699_vm1 = vcmp.lt.s32.totalorder %v1698_v57, 2  ;;  %vm1700_vm3 = vcmp.eq.s32.totalorder %v1698_v57, 0 }
 0x259   : > { %v1687_v0 = vadd.f32 1.0, %v1686_v15  ;;  %v1694_v17 = vadd.f32 1.0, %v1693_v50  ;;  %v1755_v3 = vsel %vm1741_vm0, %v1752_v28, %v1754_v38  ;;  %v1751_v11 = vsel %vm1741_vm0, %v1748_v29, %v1750_v41 }
 0x25a   : > { %vm2276_vm5 = vcmp.lt.s32.totalorder %v2275_v7, 0  ;;  %v2277_v23 = vsub.s32 0, %v2275_v7  ;;  %vm1703_vm4 = vcmp.eq.s32.totalorder %v1698_v57, 2  ;;  %v1757_v40 = vand.u32 65535, %v4119_v62 }
 0x25b   : > { %v1695_v25 = vmul.f32 %v1694_v17, %v1679_v39  ;;  %v1704_v59 = vxor.u32 2147483648, %v1687_v0  ;;  %v1759_v39 = vand.u32 65535, %v1755_v3  ;;  %v1760_v47 = vshrl.u32 %v1755_v3, 16 }
 0x25c   : > { %v2278_v13 = vsel %vm2276_vm5, %v2277_v23, %v2275_v7  ;;  %v1758_v4 = vshrl.u32 %v4119_v62, 16  ;;  %vm1696_vm6 = vweird.f32 %v3713_v31  ;;  %v1782_v1 = vshrl.u32 %v1751_v11, 16 }
 0x25d   : > { %v1701_v33 = vxor.u32 2147483648, %v1695_v25  ;;  %v1705_v42 = vsel %vm1703_vm4, %v1704_v59, %v1695_v25  ;;  %v2279_v56 = vclz %v2278_v13  ;;  %v1762_v6 = vmul.u32 %v1760_v47, %v1757_v40 }
 0x25e   : > { %v1763_v51 = vmul.u32 %v1759_v39, %v1758_v4  ;;  %v1781_v18 = vand.u32 65535, %v1751_v11  ;;  %v2267_v60 = vadd.s32 %v4068_v36, %v4066_v19  ;;  %v1761_v12 = vmul.u32 %v1759_v39, %v1757_v40 }
 0x25f   : > { %v1702_v35 = vsel %vm1700_vm3, %v1687_v0, %v1701_v33  ;;  %v2481_v53 = vadd.s32 4294967294, %v2279_v56  ;;  %v1764_v30 = vmul.u32 %v1760_v47, %v1758_v4  ;;  %v1765_v24 = vshll.u32 %v1762_v6, 16 }
 0x260   : > { %v1706_v9 = vsel %vm1699_vm1, %v1702_v35, %v1705_v42  ;;  %v1766_v14 = vshrl.u32 %v1762_v6, 16  ;;  %v1767_v8 = vshll.u32 %v1763_v51, 16  ;;  %v1784_v31 = vmul.u32 %v1782_v1, %v1757_v40 }
 0x261   : > { %v1707_v61 = vsel %vm1696_vm6, nan, %v1706_v9  ;;  %vm2482_vm7 = vcmp.lt.s32.totalorder %v2481_v53, 0  ;;  %vm1769_vm8 = vc.u32 %v1761_v12, %v1765_v24  ;;  %v1771_v58 = vadd.s32 %v1765_v24, %v1761_v12 }
 0x262   : > { %2336 = vst [vmem:[%s3055_s24 + $0x40] sm:$0xff] %v1707_v61  ;;  %v2282_v49 = vsel %vm2482_vm7, 0, %v2481_v53  ;;  %v1785_v43 = vmul.u32 %v1781_v18, %v1758_v4  ;;  %v1770_v45 = vsel %vm1769_vm8, 1, %v2635_v5  ;;  %v1783_v57 = vmul.u32 %v1781_v18, %v1757_v40 }
 0x263   : > { %v2283_v55 = vsub.s32 32, %v2282_v49  ;;  %v2287_v48 = vsub.s32 4294967266, %v2282_v49  ;;  %v1772_v26 = vadd.s32 %v1770_v45, %v1764_v30  ;;  %vm1773_vm9 = vc.u32 %v1771_v58, %v1767_v8 }
 0x264   : > { %v1786_v37 = vmul.u32 %v1782_v1, %v1758_v4  ;;  %v1787_v19 = vshll.u32 %v1784_v31, 16  ;;  %v2284_v36 = vshll.u32 %v2275_v7, %v2282_v49  ;;  %v1774_v54 = vsel %vm1773_vm9, 1, %v2635_v5 }
 0x265   : > { %v2285_v15 = vshrl.u32 %v2267_v60, %v2283_v55  ;;  %v2288_v50 = vadd.s32 127, %v2287_v48  ;;  %v1776_v63 = vadd.s32 %v1774_v54, %v1772_v26  ;;  %v1789_v0 = vshll.u32 %v1785_v43, 16 }
 0x266   : > { %vm1791_vm11 = vc.u32 %v1783_v57, %v1787_v19  ;;  %v1793_v17 = vadd.s32 %v1787_v19, %v1783_v57  ;;  %v1724_v29 = vshrl.u32 %v2629_v46, %v4064_v27  ;;  %v1745_v38 = vsel %vm1743_vm14, %v4092_v52, 2102212464 }
 0x267   : > { %v2286_v16 = vor.u32 %v2285_v15, %v2284_v36  ;;  %v2289_v28 = vshll.u32 %v2288_v50, 23  ;;  %v1792_v41 = vsel %vm1791_vm11, 1, %v2635_v5  ;;  %v1777_v25 = vadd.s32 %v1776_v63, %v1766_v14 }
 0x268   : > { %v1794_v59 = vadd.s32 %v1792_v41, %v1786_v37  ;;  %vm1795_vm10 = vc.u32 %v1793_v17, %v1789_v0  ;;  %v1768_v3 = vshrl.u32 %v1763_v51, 16  ;;  %v1744_v23 = vsel %vm1740_vm15, %v1724_v29, %v4094_v10 }
 0x269   : > { %v2290_v7 = vor.u32 4788187, %v2289_v28  ;;  %v1796_v33 = vsel %vm1795_vm10, 1, %v2635_v5  ;;  %v1788_v11 = vshrl.u32 %v1784_v31, 16  ;;  %v2293_v27 = vcvt.s32.f32 %v2286_v16 }
 0x26a   : > { %v1798_v40 = vadd.s32 %v1796_v33, %v1794_v59  ;;  %v1746_v39 = vsel %vm1742_vm2, %v4087_v32, %v1745_v38  ;;  %v1778_v52 = vadd.s32 %v1777_v25, %v1768_v3  ;;  %v1790_v47 = vshrl.u32 %v1785_v43, 16 }
 0x26b   : > { %v2291_v46 = vand.u32 2147483647, %v2290_v7  ;;  %v1797_v13 = vadd.s32 %v1793_v17, %v1789_v0  ;;  %v1747_v5 = vsel %vm1741_vm0, %v1744_v23, %v1746_v39  ;;  %vm2175_vm13 = vcmp.lt.s32.totalorder %v3928_v22, 0 }
 0x26c   : > { %v1799_v35 = vadd.s32 %v1798_v40, %v1788_v11  ;;  %vm4153_vm14 = vcmp.le.f32.partialorder %v2173_v21, 0.7853982  ;;  %v1801_v1 = vmul.u32 %v4119_v62, %v1747_v5  ;;  %v2297_v61 = vsub.s32 4, %v4096_v2 }
 0x26d   : > { %v2294_v42 = vmul.f32 %v2293_v27, %v2291_v46  ;;  %vm1803_vm12 = vc.u32 %v1778_v52, %v1797_v13  ;;  %vm2316_vm2 = vweird.f32 %v3928_v22  ;;  %v1802_v41 = vadd.s32 %v1797_v13, %v1778_v52 }
 0x26e   : > { %v1800_v4 = vadd.s32 %v1799_v35, %v1790_v47  ;;  %v2298_v21 = vsel %vm2175_vm13, %v2297_v61, %v4096_v2  ;;  %vm1710_vm4 = vcmp.lt.s32.totalorder %v3962_v20, 0  ;;  %vm1709_vm6 = vcmp.le.f32.partialorder %v1708_v34, 0.7853982 }
 0x26f   : > { %v2295_v9 = vxor.u32 2147483648, %v2294_v42  ;;  %v2300_v62 = vsel %vm4153_vm14, 0, %v2298_v21  ;;  %vm1851_vm11 = vweird.f32 %v3962_v20 }
 0x270   : > { %v1804_v10 = vadd.s32 1, %v1800_v4  ;;  %v2317_v48 = vadd.s32 3, %v2300_v62 }
 0x271   : > { %v2296_v32 = vsel %vm2175_vm13, %v2295_v9, %v2294_v42 }
 0x272   : > { %v2299_v44 = vsel %vm4153_vm14, %v3928_v22, %v2296_v32  ;;  %v1805_v6 = vsel %vm1803_vm12, %v1804_v10, %v1800_v4  ;;  %v2318_v36 = vand.u32 3, %v2317_v48 }
 0x273   : > { %v2301_v51 = vmul.f32 %v2299_v44, %v2299_v44  ;;  %v1806_v18 = vadd.s32 %v1805_v6, %v1801_v1 }
 0x274   : > { %vm2320_vm0 = vcmp.eq.s32.totalorder %v2318_v36, 0  ;;  %vm2323_vm1 = vcmp.eq.s32.totalorder %v2318_v36, 2  ;;  %vm2319_vm5 = vcmp.lt.s32.totalorder %v2318_v36, 2 }
 0x275   : > { %v2302_v53 = vmul.f32 -0.001358992, %v2301_v51  ;;  %v2309_v60 = vmul.f32 -0.00019511016, %v2301_v51  ;;  %v1807_v12 = vadd.s32 536870912, %v1806_v18 }
 0x277   : > { %v2303_v30 = vadd.f32 0.041655596, %v2302_v53  ;;  %v2310_v24 = vadd.f32 0.008332121, %v2309_v60  ;;  %v1808_v14 = vshrl.u32 %v1807_v12, 30 }
 0x279   : > { %v2304_v8 = vmul.f32 %v2303_v30, %v2301_v51  ;;  %v2311_v31 = vmul.f32 %v2310_v24, %v2301_v51  ;;  %v1809_v49 = vshll.u32 %v1808_v14, 30  ;;  %v1832_v47 = vsub.s32 4, %v1808_v14 }
 0x27b   : > { %v2305_v58 = vadd.f32 -0.4999988, %v2304_v8  ;;  %v2312_v43 = vadd.f32 -0.16666654, %v2311_v31  ;;  %v1810_v55 = vsub.s32 %v1806_v18, %v1809_v49  ;;  %v1833_v4 = vsel %vm1710_vm4, %v1832_v47, %v1808_v14 }
 0x27c   : > { %v1835_v56 = vsel %vm1709_vm6, 0, %v1833_v4 }
 0x27d   : > { %v2306_v45 = vmul.f32 %v2305_v58, %v2301_v51  ;;  %v2313_v57 = vmul.f32 %v2312_v43, %v2301_v51  ;;  %vm1811_vm15 = vcmp.lt.s32.totalorder %v1810_v55, 0  ;;  %v1812_v26 = vsub.s32 0, %v1810_v55 }
 0x27e   : > { %v1852_v6 = vadd.s32 3, %v1835_v56 }
 0x27f   : > { %v2307_v37 = vadd.f32 1.0, %v2306_v45  ;;  %v2314_v19 = vadd.f32 1.0, %v2313_v57  ;;  %v1813_v2 = vsel %vm1811_vm15, %v1812_v26, %v1810_v55 }
 0x280   : > { %v1814_v15 = vclz %v1813_v2  ;;  %v1853_v60 = vand.u32 3, %v1852_v6 }
 0x281   : > { %v2315_v50 = vmul.f32 %v2314_v19, %v2299_v44  ;;  %v2324_v54 = vxor.u32 2147483648, %v2307_v37 }
 0x282   : > { %v2472_v63 = vadd.s32 4294967294, %v1814_v15  ;;  %vm1855_vm7 = vcmp.eq.s32.totalorder %v1853_v60, 0  ;;  %vm1858_vm8 = vcmp.eq.s32.totalorder %v1853_v60, 2  ;;  %vm1854_vm9 = vcmp.lt.s32.totalorder %v1853_v60, 2 }
 0x283   : > { %v2321_v0 = vxor.u32 2147483648, %v2315_v50  ;;  %v2325_v16 = vsel %vm2323_vm1, %v2324_v54, %v2315_v50 }
 0x284   : > { %vm2473_vm3 = vcmp.lt.s32.totalorder %v2472_v63, 0 }
 0x285   : > { %v2322_v17 = vsel %vm2320_vm0, %v2307_v37, %v2321_v0  ;;  %v1817_v28 = vsel %vm2473_vm3, 0, %v2472_v63 }
 0x286   : > { %v2326_v29 = vsel %vm2319_vm5, %v2322_v17, %v2325_v16  ;;  %v1818_v38 = vsub.s32 32, %v1817_v28  ;;  %v1822_v25 = vsub.s32 4294967266, %v1817_v28  ;;  %v1819_v7 = vshll.u32 %v1810_v55, %v1817_v28 }
 0x287   : > { %v2327_v59 = vsel %vm2316_vm2, nan, %v2326_v29 }
 0x288   : > { %2340 = vst [vmem:[%s3055_s24 + $0x60] sm:$0xff] %v2327_v59  ;;  %v1820_v3 = vshrl.u32 %v1802_v41, %v1818_v38  ;;  %v1823_v33 = vadd.s32 127, %v1822_v25 }
 0x28a   : > { %v1821_v23 = vor.u32 %v1820_v3, %v1819_v7  ;;  %v1824_v11 = vshll.u32 %v1823_v33, 23 }
 0x28c   : > { %v1825_v40 = vor.u32 4788187, %v1824_v11  ;;  %v1828_v46 = vcvt.s32.f32 %v1821_v23 }
 0x28e   : > { %v1826_v22 = vand.u32 2147483647, %v1825_v40 }
 0x290   : > { %v1829_v27 = vmul.f32 %v1828_v46, %v1826_v22 }
 0x292   : > { %v1830_v39 = vxor.u32 2147483648, %v1829_v27 }
 0x294   : > { %v1831_v52 = vsel %vm1710_vm4, %v1830_v39, %v1829_v27 }
 0x295   : > { %v1834_v35 = vsel %vm1709_vm6, %v3962_v20, %v1831_v52 }
 0x296   : > { %v1836_v42 = vmul.f32 %v1834_v35, %v1834_v35 }
 0x298   : > { %v1837_v13 = vmul.f32 -0.001358992, %v1836_v42  ;;  %v1844_v5 = vmul.f32 -0.00019511016, %v1836_v42 }
 0x29a   : > { %v1838_v9 = vadd.f32 0.041655596, %v1837_v13  ;;  %v1845_v10 = vadd.f32 0.008332121, %v1844_v5 }
 0x29c   : > { %v1839_v32 = vmul.f32 %v1838_v9, %v1836_v42  ;;  %v1846_v1 = vmul.f32 %v1845_v10, %v1836_v42 }
 0x29e   : > { %v1840_v61 = vadd.f32 -0.4999988, %v1839_v32  ;;  %v1847_v44 = vadd.f32 -0.16666654, %v1846_v1 }
 0x2a0   : > { %v1841_v51 = vmul.f32 %v1840_v61, %v1836_v42  ;;  %v1848_v18 = vmul.f32 %v1847_v44, %v1836_v42 }
 0x2a2   : > { %v1842_v34 = vadd.f32 1.0, %v1841_v51  ;;  %v1849_v53 = vadd.f32 1.0, %v1848_v18 }
 0x2a4   : > { %v1850_v12 = vmul.f32 %v1849_v53, %v1834_v35  ;;  %v1859_v21 = vxor.u32 2147483648, %v1842_v34 }
 0x2a6   : > { %v1856_v30 = vxor.u32 2147483648, %v1850_v12  ;;  %v1860_v14 = vsel %vm1858_vm8, %v1859_v21, %v1850_v12 }
 0x2a7   : > { %2348 = sbr.rel (!%p2697_p5) target bundleno = 715 (0x2cb), region = 36 }
 0x2a8   : > { %v1857_v24 = vsel %vm1855_vm7, %v1842_v34, %v1856_v30 }
 0x2a9   : > { %v1861_v62 = vsel %vm1854_vm9, %v1857_v24, %v1860_v14 }
 0x2aa   : > { %v1862_v8 = vsel %vm1851_vm11, nan, %v1861_v62 }
 0x2ab   : > { %2337 = vst [vmem:[%s3055_s24 + $0x48] sm:$0xff] %v1862_v8 }
 0x2ac   : > { %s4266_s4 = smov (!%p2351_p11, %s2350_s4), 13 }
 0x2ad   : > { %s2483_s5 = sshll.u32 %s4266_s4, 3 }
 0x2ae   : > { %s2354_s6 = ssub.s32 104, %s2483_s5 }
 0x2af   : > { %s2355_s7 = sshll.u32 %s2354_s6, 4 }
 0x2b0   : > { %2356 = vsyncadd %s4175_s30, %s2355_s7  ;;  %p4184_p12 = scmp.ne.s32.totalorder %s2483_s5, 0  ;;  %s2490_s22 = smul.u32 104, %s2680_s16 }
 0x2b1   : > { %s2361_s9 = sshll.u32 %s3055_s24, 4  ;;  %s2487_s28 = sshll.u32 %s4266_s4, 7  ;;  %s4194_s9 = int_to_ptr.vmem [resolvable:$true] %s2361_s9 }
 0x2b2   : > { %s2359_s17 = scalar_lea.hbm %s4239_s3, %s2490_s22  ;;  %s2554_s20 = sshra.s32 %s4194_s9, 4  ;;  %s2555_s20 = int_to_ptr.vmem [resolvable:$true] %s2554_s20 }
 0x2b3   : > { %s2363_s19 = sshll.u32 %s2359_s17, 4  ;;  %s2556_s25 = sshrl.u32 %s2487_s28, 4  ;;  %s4196_s19 = int_to_ptr.hbm [resolvable:$true] %s2363_s19 }
 0x2b4   : > { %s2561_s26 = scalar_lea.vmem %s2555_s20, %s2556_s25  ;;  %s2636_s16 = smov [#allocation2]  }
 0x2b5   : > { %p2562_p13 = scmp.ne.s32.totalorder %s2555_s20, %s2561_s26  ;;  %s2565_s24 = scalar_lea.vmem %s2636_s16, 208 }
 0x2b6   : > { %p2567_p2 = scmp.lt.s32.totalorder %s2565_s24, %s2561_s26 }
 0x2b7   : > { %p2563_p0 = pnand %p2562_p13, %p4184_p12 }
 0x2b9   : > { %p2564_p1 = pneg %p2563_p0 }
 0x2bb   : > { %p2569_p3 = pnand %p2567_p2, %p2564_p1 }
 0x2bd   : > { %2572 = shalt.err (!%p2569_p3)
}
 0x2be   : > { %s2573_s27 = sshra.s32 %s4196_s19, 4  ;;  %s2584_s7 = scalar_lea.hbm %s4239_s3, 200  ;;  %s2574_s27 = int_to_ptr.hbm [resolvable:$true] %s2573_s27 }
 0x2bf   : > { %s2580_s29 = scalar_lea.hbm %s2574_s27, %s2556_s25  ;;  %p2585_p8 = scmp.lt.s32.totalorder %s2574_s27, %s4239_s3 }
 0x2c0   : > { %p2581_p4 = scmp.ne.s32.totalorder %s2574_s27, %s2580_s29  ;;  %p2586_p9 = scmp.lt.s32.totalorder %s2584_s7, %s2580_s29 }
 0x2c2   : > { %p2582_p5 = pnand %p2581_p4, %p4184_p12  ;;  %p2587_p10 = por %p2586_p9, %p2585_p8 }
 0x2c4   : > { %p2583_p7 = pneg %p2582_p5 }
 0x2c6   : > { %p2588_p11 = pnand %p2587_p10, %p2583_p7 }
 0x2c8   : > { %2591 = shalt.err (!%p2588_p11)
}
 0x2c9   : > { %s2637_s11 = smov 128   ;;  %s2638_s17 = smov 8  }
 0x2ca   : > { %2369 = dma.vmem_to_hbm [thread:$0]  (%p4184_p12), %s4194_s9, %s2487_s28, %s4196_s19, %s4175_s30, %s2637_s11, %s2637_s11, %s2638_s17  }
 0x2cb PF: > { %p2509_p13 = scmp.ge.s32.totalorder %s2627_s15, 2  ;;  %s2378_s20 = sand.u32 1, %s2615_s12  }
 0x2cc   : > { %s2379_s25 = scalar_lea.sflag [#allocation3], %s2378_s20 }
 0x2cd   : > { %p2506_p0 = pnand %p2509_p13, %p2701_p6 }
 0x2cf   : > { %p2507_p1 = pneg %p2506_p0 }
 0x2d1   : > { %2610 = dma.done.wait (%p2507_p1), %s2379_s25, 1664  }
 0x2d2   : > { %2612 = vsyncadd (%p2507_p1), %s2379_s25, 4294965632  ;;  %p13_p2 = scmp.ge.s32.totalorder %s2684_s18, 4   ;;  %s4261_s12 = smov %s2619_s13 }
 0x2d3   : > { %s4262_s13 = smov %s2623_s14  ;;  %s4263_s14 = smov %s2695_s21 }
 0x2d4   : > { %s4264_s15 = smov %s2684_s18  ;;  %15 = sbr.rel (!%p13_p2) target bundleno = 3 (0x3), region = 67 }
 0x2d9   :  { %2385 = vsyncpa [#allocation3], 1 }
 0x2da   :  { %2387 = vsyncpa [#allocation3 + $0x1], 1 }

</bundles_post_ra>
